<compile_context>
chip_gen: v5e
topology: v5e:2x2
jax: 0.10.0
libtpu: 0.0.40
codegen_flags: <defaults>
</compile_context>

<pallas_src>
import jax
import jax.numpy as jnp
from jax import lax
from jax.experimental import pallas as pl
from jax.experimental.pallas import tpu as pltpu

K = 4        # kernel_size
STRIDE = 2
PAD = 1
EPS = 1e-5


def _pick_co_tile(c_out):
    """C_out tile for the parallel grid axis (full if small, else a 128-multiple)."""
    if c_out <= 256:
        return c_out
    for t in (256, 128):
        if c_out % t == 0:
            return t
    return c_out


def deconv_block(x, w_t, bias, gamma, beta, batch_norm=True):
    """x: (N, C_in, H, W) f32; w_t: (C_in, C_out, K, K) (PyTorch ConvTranspose2d layout)."""
    n, c_in, h, w = x.shape
    c_out = w_t.shape[1]
    ho, wo = h * STRIDE, w * STRIDE
    wp = w + 2                     # padded row width (1 zero column each side)
    sw = h * wp                    # matmul output columns per parity plane (2-col halo / row)
    lf = (h + 2) * wp + 2          # flattened padded image length (+2 keeps all slab slices in range)
    m_cnt = float(n * 4 * h * w)   # valid elements per channel for BatchNorm statistics

    co_tile = _pick_co_tile(c_out)
    co_tiles = c_out // co_tile

    # ---------------- glue: ReLU (f32) + pad + flatten input, build sub-pixel weights -------
    xpad = jnp.pad(jnp.maximum(x, 0.0), ((0, 0), (0, 0), (1, 1), (1, 1))).astype(jnp.bfloat16)
    xf = jnp.pad(xpad.reshape(n, c_in, (h + 2) * wp), ((0, 0), (0, 0), (0, 2)))

    # Output (2p+di, 2q+dj) uses taps a,b in {0,1}: padded-input offsets (di+a, dj+b),
    # kernel entries (3-di-2a, 3-dj-2b).
    kidx = jnp.array([[3, 1], [2, 0]], dtype=jnp.int32)          # [parity, tap] -> kernel index
    wg = w_t[:, :, kidx][:, :, :, :, kidx]                       # (ci, co, di, a, dj, b)
    wmat = (wg.transpose(2, 4, 1, 3, 5, 0)                       # (di, dj, co, a, b, ci)
              .reshape(2 * 2, c_out, 4 * c_in)
              .astype(jnp.bfloat16))
    b2 = bias.reshape(c_out, 1).astype(jnp.float32)

    # ---------------- kernel: sub-pixel deconv + fused BN statistics -------------------------
    def deconv_stats_kernel(xf_ref, w_ref, b_ref, y_ref, st_ref):
        # xf_ref: (1, C_in, lf) bf16        flattened 1-padded, ReLU'd input
        # w_ref : (4, co_tile, 4*C_in) bf16
        # b_ref : (co_tile, 1) f32
        # y_ref : (1, 4, co_tile, sw) bf16  parity planes of y (= deconv + bias)
        # st_ref: (co_tile, 2) f32          [sum, sum_sq] of the bias-free accumulator,
        #                                   accumulated across the batch grid axis
        @pl.when(pl.program_id(1) == 0)
        def _():
            st_ref[...] = jnp.zeros_like(st_ref)

        xr = xf_ref[0]                                       # (C_in, lf) bf16
        # 9 shifted contiguous views of the flattened padded image (row offset r, col offset c)
        slabs = [[xr[:, r * wp + c: r * wp + c + sw] for c in range(3)] for r in range(3)]

        # mask of valid output columns (each flattened row carries a 2-column halo);
        # (1, sw) and broadcast in jnp.where to keep vreg pressure independent of C_out.
        col = lax.broadcasted_iota(jnp.int32, (1, sw), 1)
        valid = (col % wp) < w

        bvec = b_ref[...]                                    # (co_tile, 1)
        s1 = jnp.zeros((co_tile, 1), jnp.float32)
        s2 = jnp.zeros((co_tile, 1), jnp.float32)
        for di in range(2):
            for dj in range(2):
                wpar = w_ref[di * 2 + dj]                    # (co_tile, 4*C_in)
                acc = jnp.zeros((co_tile, sw), jnp.float32)
                # 4 accumulated partial dots instead of a materialized im2col concatenate.
                for a in range(2):
                    for b in range(2):
                        k0 = (a * 2 + b) * c_in
                        acc = acc + jnp.dot(wpar[:, k0:k0 + c_in], slabs[di + a][dj + b],
                                            preferred_element_type=jnp.float32)
                y_ref[0, di * 2 + dj, :, :] = (acc + bvec).astype(y_ref.dtype)
                accv = jnp.where(valid, acc, 0.0)            # bias-free, halo-masked
                s1 = s1 + jnp.sum(accv, axis=1, keepdims=True)
                s2 = s2 + jnp.sum(accv * accv, axis=1, keepdims=True)
        # NOTE: kept channel-major (co_tile, 2) to avoid an in-kernel cross-lane relayout;
        # the 2-wide store is negligible next to the bf16 y write.
        st_ref[...] += jnp.concatenate([s1, s2], axis=1)

    # explicit VMEM budget from actual block sizes (x2 double buffering + headroom)
    blk_bytes = (c_in * lf * 2                    # xf block (bf16)
                 + 4 * co_tile * 4 * c_in * 2     # weight block (bf16)
                 + co_tile * 4                    # bias block (f32)
                 + 4 * co_tile * sw * 2           # y block (bf16)
                 + co_tile * 2 * 4)               # stats block (f32)
    vmem_limit = int(min(max(4 * blk_bytes + (2 << 20), 16 << 20), 96 << 20))

    y_planes, stats = pl.pallas_call(
        deconv_stats_kernel,
        out_shape=(jax.ShapeDtypeStruct((n, 4, c_out, sw), jnp.bfloat16),
                   jax.ShapeDtypeStruct((c_out, 2), jnp.float32)),
        grid_spec=pltpu.PrefetchScalarGridSpec(
            num_scalar_prefetch=0,
            grid=(co_tiles, n),
            in_specs=[
                pl.BlockSpec((1, c_in, lf), lambda jc, i: (i, 0, 0)),
                pl.BlockSpec((4, co_tile, 4 * c_in), lambda jc, i: (0, jc, 0)),
                pl.BlockSpec((co_tile, 1), lambda jc, i: (jc, 0)),
            ],
            out_specs=(
                pl.BlockSpec((1, 4, co_tile, sw), lambda jc, i: (i, 0, jc, 0)),
                pl.BlockSpec((co_tile, 2), lambda jc, i: (jc, 0)),   # grid-resident accumulator
            ),
        ),
        # stats accumulate across the batch axis -> it must be sequential ("arbitrary");
        # the C_out-tile axis is independent -> "parallel" (megacore on v7x).
        compiler_params=pltpu.CompilerParams(
            dimension_semantics=("parallel", "arbitrary"),
            vmem_limit_bytes=vmem_limit),
    )(xf, wmat, b2)

    # ---------------- glue epilogue: BN apply fused into halo-drop + parity interleave -------
    # NOTE: y_planes halo columns contain garbage; they are only ever consumed through
    # the [..., :w] slice below.
    planes = y_planes.reshape(n, 2, 2, c_out, h, wp)[..., :w].astype(jnp.float32)
    if batch_norm:
        s1 = stats[:, 0] / m_cnt                 # E[acc] (bias-free)
        mean = s1 + bias                         # E[y]
        var = stats[:, 1] / m_cnt - s1 * s1      # biased var (PyTorch training mode)
        inv = lax.rsqrt(var + EPS)
        scale = gamma * inv
        shift = beta - mean * scale
        planes = (planes * scale[None, None, None, :, None, None]
                  + shift[None, None, None, :, None, None])
    out = planes.transpose(0, 3, 4, 1, 5, 2).reshape(n, c_out, ho, wo)
    return out


def _reference(x, w_t, bias, gamma, beta, batch_norm=True):
    """Pure-JAX reference mirroring the kernel numerics (bf16 operands + bf16 y storage,
    f32 accumulation and f32 BatchNorm statistics)."""
    xr = jnp.maximum(x, 0.0).astype(jnp.bfloat16)
    w_reg = jnp.flip(w_t, axis=(2, 3)).transpose(1, 0, 2, 3).astype(jnp.bfloat16)  # (C_out,C_in,K,K)
    y = lax.conv_general_dilated(
        xr, w_reg, window_strides=(1, 1), padding=((2, 2), (2, 2)),
        lhs_dilation=(2, 2), dimension_numbers=('NCHW', 'OIHW', 'NCHW'),
        preferred_element_type=jnp.float32,
    ) + bias[None, :, None, None]
    y_q = y.astype(jnp.bfloat16).astype(jnp.float32)   # kernel stores y in bf16
    if not batch_norm:
        return y_q
    mean = y.mean(axis=(0, 2, 3), keepdims=True)
    var = ((y - mean) ** 2).mean(axis=(0, 2, 3), keepdims=True)
    return (y_q - mean) / jnp.sqrt(var + EPS) * gamma[None, :, None, None] \
        + beta[None, :, None, None]


if __name__ == "__main__":
    key = jax.random.PRNGKey(0)
    k1, k2, k3, k4, k5 = jax.random.split(key, 5)

    N, C_IN, C_OUT, H, W = 2, 4, 8, 16, 16
    x = jax.random.normal(k1, (N, C_IN, H, W), jnp.float32)
    w_t = 0.1 * jax.random.normal(k2, (C_IN, C_OUT, K, K), jnp.float32)   # ConvTranspose2d weight
    bias = 0.1 * jax.random.normal(k3, (C_OUT,), jnp.float32)
    gamma = 1.0 + 0.1 * jax.random.normal(k4, (C_OUT,), jnp.float32)
    beta = 0.1 * jax.random.normal(k5, (C_OUT,), jnp.float32)

    fn = jax.jit(deconv_block, static_argnums=(5,))
    out_bn = jax.block_until_ready(fn(x, w_t, bias, gamma, beta, True))
    out_nobn = jax.block_until_ready(fn(x, w_t, bias, gamma, beta, False))

    assert out_bn.shape == (N, C_OUT, 2 * H, 2 * W), out_bn.shape
    ref_bn = _reference(x, w_t, bias, gamma, beta, True)
    ref_nobn = _reference(x, w_t, bias, gamma, beta, False)
    err_bn = float(jnp.max(jnp.abs(out_bn - ref_bn)))
    err_nobn = float(jnp.max(jnp.abs(out_nobn - ref_nobn)))
    assert jnp.allclose(out_bn, ref_bn, atol=1e-2, rtol=1e-2), err_bn
    assert jnp.allclose(out_nobn, ref_nobn, atol=1e-2, rtol=1e-2), err_nobn

    print("KERNEL_OK")
</pallas_src>

<mosaic_0001>
module attributes {stable_mosaic.version = 11 : i64} {
  func.func @deconv_stats_kernel(%arg0: i32, %arg1: i32, %arg2: memref<1x4x326xbf16, #tpu.memory_space<vmem>>, %arg3: memref<4x8x16xbf16, #tpu.memory_space<vmem>>, %arg4: memref<8x1xf32, #tpu.memory_space<vmem>>, %arg5: memref<1x4x8x288xbf16, #tpu.memory_space<vmem>>, %arg6: memref<8x2xf32, #tpu.memory_space<vmem>>) attributes {dimension_semantics = [#tpu.dimension_semantics<parallel>, #tpu.dimension_semantics<arbitrary>], iteration_bounds = array<i64: 1, 2>, scalar_prefetch = 0 : i64, scratch_operands = 0 : i64, tpu.core_type = #tpu.core_type<tc>, window_params = [{transform_indices = @transform_0, window_bounds = array<i64: 1, 4, 326>}, {transform_indices = @transform_1, window_bounds = array<i64: 4, 8, 16>}, {transform_indices = @transform_2, window_bounds = array<i64: 8, 1>}, {transform_indices = @transform_3, window_bounds = array<i64: 1, 4, 8, 288>}, {transform_indices = @transform_4, window_bounds = array<i64: 8, 2>}]} {
    %c0_i32 = arith.constant 0 : i32
    %0 = arith.cmpi eq, %arg1, %c0_i32 : i32
    %1 = arith.extui %0 : i1 to i32
    %c0_i32_0 = arith.constant 0 : i32
    %2 = arith.cmpi ne, %1, %c0_i32_0 : i32
    scf.if %2 {
      %cst_71 = arith.constant 0.000000e+00 : f32
      %168 = vector.broadcast %cst_71 : f32 to vector<8x2xf32>
      %c0_72 = arith.constant 0 : index
      %c0_73 = arith.constant 0 : index
      %169 = vector.load %arg6[%c0_72, %c0_73] : memref<8x2xf32, #tpu.memory_space<vmem>>, vector<8x2xf32>
      tpu.vector_store %arg6[%c0_72, %c0_73], %168 {strides = array<i32>} : memref<8x2xf32, #tpu.memory_space<vmem>>, vector<8x2xf32>,
    } else {
    }
    %c0 = arith.constant 0 : index
    %c0_1 = arith.constant 0 : index
    %c0_2 = arith.constant 0 : index
    %3 = vector.load %arg2[%c0, %c0_1, %c0_2] : memref<1x4x326xbf16, #tpu.memory_space<vmem>>, vector<1x4x326xbf16>
    %4 = vector.shape_cast %3 : vector<1x4x326xbf16> to vector<4x326xbf16>
    %5 = vector.extract_strided_slice %4 {offsets = [0, 0], sizes = [4, 288], strides = [1, 1]} : vector<4x326xbf16> to vector<4x288xbf16>
    %6 = vector.extract_strided_slice %4 {offsets = [0, 1], sizes = [4, 288], strides = [1, 1]} : vector<4x326xbf16> to vector<4x288xbf16>
    %7 = vector.extract_strided_slice %4 {offsets = [0, 2], sizes = [4, 288], strides = [1, 1]} : vector<4x326xbf16> to vector<4x288xbf16>
    %8 = vector.extract_strided_slice %4 {offsets = [0, 18], sizes = [4, 288], strides = [1, 1]} : vector<4x326xbf16> to vector<4x288xbf16>
    %9 = vector.extract_strided_slice %4 {offsets = [0, 19], sizes = [4, 288], strides = [1, 1]} : vector<4x326xbf16> to vector<4x288xbf16>
    %10 = vector.extract_strided_slice %4 {offsets = [0, 20], sizes = [4, 288], strides = [1, 1]} : vector<4x326xbf16> to vector<4x288xbf16>
    %11 = vector.extract_strided_slice %4 {offsets = [0, 36], sizes = [4, 288], strides = [1, 1]} : vector<4x326xbf16> to vector<4x288xbf16>
    %12 = vector.extract_strided_slice %4 {offsets = [0, 37], sizes = [4, 288], strides = [1, 1]} : vector<4x326xbf16> to vector<4x288xbf16>
    %13 = vector.extract_strided_slice %4 {offsets = [0, 38], sizes = [4, 288], strides = [1, 1]} : vector<4x326xbf16> to vector<4x288xbf16>
    %14 = tpu.iota {dimensions = array<i32: 1>} : vector<1x288xi32>
    %c18_i32 = arith.constant 18 : i32
    %c0_i32_3 = arith.constant 0 : i32
    %15 = arith.cmpi eq, %c18_i32, %c0_i32_3 : i32
    %c1_i32 = arith.constant 1 : i32
    %16 = arith.select %15, %c1_i32, %c18_i32 : i32
    %17 = vector.broadcast %16 : i32 to vector<1x288xi32>
    %18 = arith.remsi %14, %17 : vector<1x288xi32>
    %c0_i32_4 = arith.constant 0 : i32
    %19 = vector.broadcast %c0_i32_4 : i32 to vector<1x288xi32>
    %20 = arith.cmpi ne, %18, %19 : vector<1x288xi32>
    %c0_i32_5 = arith.constant 0 : i32
    %21 = vector.broadcast %c0_i32_5 : i32 to vector<1x288xi32>
    %22 = arith.cmpi slt, %18, %21 : vector<1x288xi32>
    %c0_i32_6 = arith.constant 0 : i32
    %23 = arith.cmpi slt, %16, %c0_i32_6 : i32
    %24 = vector.broadcast %23 : i1 to vector<1x288xi1>
    %25 = vector.broadcast %24 : vector<1x288xi1> to vector<1x288xi1>
    %26 = arith.xori %22, %25 : vector<1x288xi1>
    %27 = arith.andi %26, %20 : vector<1x288xi1>
    %28 = vector.broadcast %16 : i32 to vector<1x288xi32>
    %29 = arith.addi %18, %28 : vector<1x288xi32>
    %30 = arith.select %27, %29, %18 : vector<1x288xi1>, vector<1x288xi32>
    %c16_i32 = arith.constant 16 : i32
    %31 = vector.broadcast %c16_i32 : i32 to vector<1x288xi32>
    %32 = arith.cmpi slt, %30, %31 : vector<1x288xi32>
    %c0_7 = arith.constant 0 : index
    %c0_8 = arith.constant 0 : index
    %33 = vector.load %arg4[%c0_7, %c0_8] : memref<8x1xf32, #tpu.memory_space<vmem>>, vector<8x1xf32>
    %cst = arith.constant 0.000000e+00 : f32
    %34 = vector.broadcast %cst : f32 to vector<8x1xf32>
    %cst_9 = arith.constant 0.000000e+00 : f32
    %35 = vector.broadcast %cst_9 : f32 to vector<8x1xf32>
    %c0_10 = arith.constant 0 : index
    %c0_11 = arith.constant 0 : index
    %c0_12 = arith.constant 0 : index
    %36 = vector.load %arg3[%c0_10, %c0_11, %c0_12] : memref<4x8x16xbf16, #tpu.memory_space<vmem>>, vector<1x8x16xbf16>
    %37 = vector.shape_cast %36 : vector<1x8x16xbf16> to vector<8x16xbf16>
    %cst_13 = arith.constant 0.000000e+00 : f32
    %38 = vector.broadcast %cst_13 : f32 to vector<8x288xf32>
    %39 = vector.extract_strided_slice %37 {offsets = [0, 0], sizes = [8, 4], strides = [1, 1]} : vector<8x16xbf16> to vector<8x4xbf16>
    %cst_14 = arith.constant dense<0.000000e+00> : vector<8x288xf32>
    %40 = tpu.matmul %39, %5, %cst_14 {dimension_numbers = #tpu.dot_dimension_numbers<[1], [0], [0], [1], [0, 0, 1, 1], [], []>} : vector<8x4xbf16>, vector<4x288xbf16>, vector<8x288xf32> -> vector<8x288xf32>
    %41 = arith.addf %38, %40 : vector<8x288xf32>
    %42 = vector.extract_strided_slice %37 {offsets = [0, 4], sizes = [8, 4], strides = [1, 1]} : vector<8x16xbf16> to vector<8x4xbf16>
    %cst_15 = arith.constant dense<0.000000e+00> : vector<8x288xf32>
    %43 = tpu.matmul %42, %6, %cst_15 {dimension_numbers = #tpu.dot_dimension_numbers<[1], [0], [0], [1], [0, 0, 1, 1], [], []>} : vector<8x4xbf16>, vector<4x288xbf16>, vector<8x288xf32> -> vector<8x288xf32>
    %44 = arith.addf %41, %43 : vector<8x288xf32>
    %45 = vector.extract_strided_slice %37 {offsets = [0, 8], sizes = [8, 4], strides = [1, 1]} : vector<8x16xbf16> to vector<8x4xbf16>
    %cst_16 = arith.constant dense<0.000000e+00> : vector<8x288xf32>
    %46 = tpu.matmul %45, %8, %cst_16 {dimension_numbers = #tpu.dot_dimension_numbers<[1], [0], [0], [1], [0, 0, 1, 1], [], []>} : vector<8x4xbf16>, vector<4x288xbf16>, vector<8x288xf32> -> vector<8x288xf32>
    %47 = arith.addf %44, %46 : vector<8x288xf32>
    %48 = vector.extract_strided_slice %37 {offsets = [0, 12], sizes = [8, 4], strides = [1, 1]} : vector<8x16xbf16> to vector<8x4xbf16>
    %cst_17 = arith.constant dense<0.000000e+00> : vector<8x288xf32>
    %49 = tpu.matmul %48, %9, %cst_17 {dimension_numbers = #tpu.dot_dimension_numbers<[1], [0], [0], [1], [0, 0, 1, 1], [], []>} : vector<8x4xbf16>, vector<4x288xbf16>, vector<8x288xf32> -> vector<8x288xf32>
    %50 = arith.addf %47, %49 : vector<8x288xf32>
    %51 = vector.broadcast %33 : vector<8x1xf32> to vector<8x288xf32>
    %52 = arith.addf %50, %51 : vector<8x288xf32>
    %53 = arith.truncf %52 : vector<8x288xf32> to vector<8x288xbf16>
    %c0_18 = arith.constant 0 : index
    %c0_19 = arith.constant 0 : index
    %c0_20 = arith.constant 0 : index
    %c0_21 = arith.constant 0 : index
    %54 = vector.load %arg5[%c0_18, %c0_19, %c0_20, %c0_21] : memref<1x4x8x288xbf16, #tpu.memory_space<vmem>>, vector<1x1x8x288xbf16>
    %55 = vector.shape_cast %54 : vector<1x1x8x288xbf16> to vector<8x288xbf16>
    %56 = vector.shape_cast %53 : vector<8x288xbf16> to vector<1x1x8x288xbf16>
    tpu.vector_store %arg5[%c0_18, %c0_19, %c0_20, %c0_21], %56 {strides = array<i32>} : memref<1x4x8x288xbf16, #tpu.memory_space<vmem>>, vector<1x1x8x288xbf16>,
    %cst_22 = arith.constant 0.000000e+00 : f32
    %57 = vector.shape_cast %32 : vector<1x288xi1> to vector<1x288xi1>
    %58 = vector.broadcast %57 : vector<1x288xi1> to vector<8x288xi1>
    %59 = vector.broadcast %cst_22 : f32 to vector<8x288xf32>
    %60 = arith.select %58, %50, %59 : vector<8x288xi1>, vector<8x288xf32>
    %cst_23 = arith.constant dense<0.000000e+00> : vector<8xf32>
    %61 = vector.multi_reduction <add>, %60, %cst_23 [1] : vector<8x288xf32> to vector<8xf32>
    %62 = vector.shape_cast %61 : vector<8xf32> to vector<8x1xf32>
    %63 = arith.addf %34, %62 : vector<8x1xf32>
    %64 = arith.mulf %60, %60 : vector<8x288xf32>
    %cst_24 = arith.constant dense<0.000000e+00> : vector<8xf32>
    %65 = vector.multi_reduction <add>, %64, %cst_24 [1] : vector<8x288xf32> to vector<8xf32>
    %66 = vector.shape_cast %65 : vector<8xf32> to vector<8x1xf32>
    %67 = arith.addf %35, %66 : vector<8x1xf32>
    %c1 = arith.constant 1 : index
    %c0_25 = arith.constant 0 : index
    %c0_26 = arith.constant 0 : index
    %68 = vector.load %arg3[%c1, %c0_25, %c0_26] : memref<4x8x16xbf16, #tpu.memory_space<vmem>>, vector<1x8x16xbf16>
    %69 = vector.shape_cast %68 : vector<1x8x16xbf16> to vector<8x16xbf16>
    %cst_27 = arith.constant 0.000000e+00 : f32
    %70 = vector.broadcast %cst_27 : f32 to vector<8x288xf32>
    %71 = vector.extract_strided_slice %69 {offsets = [0, 0], sizes = [8, 4], strides = [1, 1]} : vector<8x16xbf16> to vector<8x4xbf16>
    %cst_28 = arith.constant dense<0.000000e+00> : vector<8x288xf32>
    %72 = tpu.matmul %71, %6, %cst_28 {dimension_numbers = #tpu.dot_dimension_numbers<[1], [0], [0], [1], [0, 0, 1, 1], [], []>} : vector<8x4xbf16>, vector<4x288xbf16>, vector<8x288xf32> -> vector<8x288xf32>
    %73 = arith.addf %70, %72 : vector<8x288xf32>
    %74 = vector.extract_strided_slice %69 {offsets = [0, 4], sizes = [8, 4], strides = [1, 1]} : vector<8x16xbf16> to vector<8x4xbf16>
    %cst_29 = arith.constant dense<0.000000e+00> : vector<8x288xf32>
    %75 = tpu.matmul %74, %7, %cst_29 {dimension_numbers = #tpu.dot_dimension_numbers<[1], [0], [0], [1], [0, 0, 1, 1], [], []>} : vector<8x4xbf16>, vector<4x288xbf16>, vector<8x288xf32> -> vector<8x288xf32>
    %76 = arith.addf %73, %75 : vector<8x288xf32>
    %77 = vector.extract_strided_slice %69 {offsets = [0, 8], sizes = [8, 4], strides = [1, 1]} : vector<8x16xbf16> to vector<8x4xbf16>
    %cst_30 = arith.constant dense<0.000000e+00> : vector<8x288xf32>
    %78 = tpu.matmul %77, %9, %cst_30 {dimension_numbers = #tpu.dot_dimension_numbers<[1], [0], [0], [1], [0, 0, 1, 1], [], []>} : vector<8x4xbf16>, vector<4x288xbf16>, vector<8x288xf32> -> vector<8x288xf32>
    %79 = arith.addf %76, %78 : vector<8x288xf32>
    %80 = vector.extract_strided_slice %69 {offsets = [0, 12], sizes = [8, 4], strides = [1, 1]} : vector<8x16xbf16> to vector<8x4xbf16>
    %cst_31 = arith.constant dense<0.000000e+00> : vector<8x288xf32>
    %81 = tpu.matmul %80, %10, %cst_31 {dimension_numbers = #tpu.dot_dimension_numbers<[1], [0], [0], [1], [0, 0, 1, 1], [], []>} : vector<8x4xbf16>, vector<4x288xbf16>, vector<8x288xf32> -> vector<8x288xf32>
    %82 = arith.addf %79, %81 : vector<8x288xf32>
    %83 = vector.broadcast %33 : vector<8x1xf32> to vector<8x288xf32>
    %84 = arith.addf %82, %83 : vector<8x288xf32>
    %85 = arith.truncf %84 : vector<8x288xf32> to vector<8x288xbf16>
    %c0_32 = arith.constant 0 : index
    %c1_33 = arith.constant 1 : index
    %c0_34 = arith.constant 0 : index
    %c0_35 = arith.constant 0 : index
    %86 = vector.load %arg5[%c0_32, %c1_33, %c0_34, %c0_35] : memref<1x4x8x288xbf16, #tpu.memory_space<vmem>>, vector<1x1x8x288xbf16>
    %87 = vector.shape_cast %86 : vector<1x1x8x288xbf16> to vector<8x288xbf16>
    %88 = vector.shape_cast %85 : vector<8x288xbf16> to vector<1x1x8x288xbf16>
    tpu.vector_store %arg5[%c0_32, %c1_33, %c0_34, %c0_35], %88 {strides = array<i32>} : memref<1x4x8x288xbf16, #tpu.memory_space<vmem>>, vector<1x1x8x288xbf16>,
    %cst_36 = arith.constant 0.000000e+00 : f32
    %89 = vector.shape_cast %32 : vector<1x288xi1> to vector<1x288xi1>
    %90 = vector.broadcast %89 : vector<1x288xi1> to vector<8x288xi1>
    %91 = vector.broadcast %cst_36 : f32 to vector<8x288xf32>
    %92 = arith.select %90, %82, %91 : vector<8x288xi1>, vector<8x288xf32>
    %cst_37 = arith.constant dense<0.000000e+00> : vector<8xf32>
    %93 = vector.multi_reduction <add>, %92, %cst_37 [1] : vector<8x288xf32> to vector<8xf32>
    %94 = vector.shape_cast %93 : vector<8xf32> to vector<8x1xf32>
    %95 = arith.addf %63, %94 : vector<8x1xf32>
    %96 = arith.mulf %92, %92 : vector<8x288xf32>
    %cst_38 = arith.constant dense<0.000000e+00> : vector<8xf32>
    %97 = vector.multi_reduction <add>, %96, %cst_38 [1] : vector<8x288xf32> to vector<8xf32>
    %98 = vector.shape_cast %97 : vector<8xf32> to vector<8x1xf32>
    %99 = arith.addf %67, %98 : vector<8x1xf32>
    %c2 = arith.constant 2 : index
    %c0_39 = arith.constant 0 : index
    %c0_40 = arith.constant 0 : index
    %100 = vector.load %arg3[%c2, %c0_39, %c0_40] : memref<4x8x16xbf16, #tpu.memory_space<vmem>>, vector<1x8x16xbf16>
    %101 = vector.shape_cast %100 : vector<1x8x16xbf16> to vector<8x16xbf16>
    %cst_41 = arith.constant 0.000000e+00 : f32
    %102 = vector.broadcast %cst_41 : f32 to vector<8x288xf32>
    %103 = vector.extract_strided_slice %101 {offsets = [0, 0], sizes = [8, 4], strides = [1, 1]} : vector<8x16xbf16> to vector<8x4xbf16>
    %cst_42 = arith.constant dense<0.000000e+00> : vector<8x288xf32>
    %104 = tpu.matmul %103, %8, %cst_42 {dimension_numbers = #tpu.dot_dimension_numbers<[1], [0], [0], [1], [0, 0, 1, 1], [], []>} : vector<8x4xbf16>, vector<4x288xbf16>, vector<8x288xf32> -> vector<8x288xf32>
    %105 = arith.addf %102, %104 : vector<8x288xf32>
    %106 = vector.extract_strided_slice %101 {offsets = [0, 4], sizes = [8, 4], strides = [1, 1]} : vector<8x16xbf16> to vector<8x4xbf16>
    %cst_43 = arith.constant dense<0.000000e+00> : vector<8x288xf32>
    %107 = tpu.matmul %106, %9, %cst_43 {dimension_numbers = #tpu.dot_dimension_numbers<[1], [0], [0], [1], [0, 0, 1, 1], [], []>} : vector<8x4xbf16>, vector<4x288xbf16>, vector<8x288xf32> -> vector<8x288xf32>
    %108 = arith.addf %105, %107 : vector<8x288xf32>
    %109 = vector.extract_strided_slice %101 {offsets = [0, 8], sizes = [8, 4], strides = [1, 1]} : vector<8x16xbf16> to vector<8x4xbf16>
    %cst_44 = arith.constant dense<0.000000e+00> : vector<8x288xf32>
    %110 = tpu.matmul %109, %11, %cst_44 {dimension_numbers = #tpu.dot_dimension_numbers<[1], [0], [0], [1], [0, 0, 1, 1], [], []>} : vector<8x4xbf16>, vector<4x288xbf16>, vector<8x288xf32> -> vector<8x288xf32>
    %111 = arith.addf %108, %110 : vector<8x288xf32>
    %112 = vector.extract_strided_slice %101 {offsets = [0, 12], sizes = [8, 4], strides = [1, 1]} : vector<8x16xbf16> to vector<8x4xbf16>
    %cst_45 = arith.constant dense<0.000000e+00> : vector<8x288xf32>
    %113 = tpu.matmul %112, %12, %cst_45 {dimension_numbers = #tpu.dot_dimension_numbers<[1], [0], [0], [1], [0, 0, 1, 1], [], []>} : vector<8x4xbf16>, vector<4x288xbf16>, vector<8x288xf32> -> vector<8x288xf32>
    %114 = arith.addf %111, %113 : vector<8x288xf32>
    %115 = vector.broadcast %33 : vector<8x1xf32> to vector<8x288xf32>
    %116 = arith.addf %114, %115 : vector<8x288xf32>
    %117 = arith.truncf %116 : vector<8x288xf32> to vector<8x288xbf16>
    %c0_46 = arith.constant 0 : index
    %c2_47 = arith.constant 2 : index
    %c0_48 = arith.constant 0 : index
    %c0_49 = arith.constant 0 : index
    %118 = vector.load %arg5[%c0_46, %c2_47, %c0_48, %c0_49] : memref<1x4x8x288xbf16, #tpu.memory_space<vmem>>, vector<1x1x8x288xbf16>
    %119 = vector.shape_cast %118 : vector<1x1x8x288xbf16> to vector<8x288xbf16>
    %120 = vector.shape_cast %117 : vector<8x288xbf16> to vector<1x1x8x288xbf16>
    tpu.vector_store %arg5[%c0_46, %c2_47, %c0_48, %c0_49], %120 {strides = array<i32>} : memref<1x4x8x288xbf16, #tpu.memory_space<vmem>>, vector<1x1x8x288xbf16>,
    %cst_50 = arith.constant 0.000000e+00 : f32
    %121 = vector.shape_cast %32 : vector<1x288xi1> to vector<1x288xi1>
    %122 = vector.broadcast %121 : vector<1x288xi1> to vector<8x288xi1>
    %123 = vector.broadcast %cst_50 : f32 to vector<8x288xf32>
    %124 = arith.select %122, %114, %123 : vector<8x288xi1>, vector<8x288xf32>
    %cst_51 = arith.constant dense<0.000000e+00> : vector<8xf32>
    %125 = vector.multi_reduction <add>, %124, %cst_51 [1] : vector<8x288xf32> to vector<8xf32>
    %126 = vector.shape_cast %125 : vector<8xf32> to vector<8x1xf32>
    %127 = arith.addf %95, %126 : vector<8x1xf32>
    %128 = arith.mulf %124, %124 : vector<8x288xf32>
    %cst_52 = arith.constant dense<0.000000e+00> : vector<8xf32>
    %129 = vector.multi_reduction <add>, %128, %cst_52 [1] : vector<8x288xf32> to vector<8xf32>
    %130 = vector.shape_cast %129 : vector<8xf32> to vector<8x1xf32>
    %131 = arith.addf %99, %130 : vector<8x1xf32>
    %c3 = arith.constant 3 : index
    %c0_53 = arith.constant 0 : index
    %c0_54 = arith.constant 0 : index
    %132 = vector.load %arg3[%c3, %c0_53, %c0_54] : memref<4x8x16xbf16, #tpu.memory_space<vmem>>, vector<1x8x16xbf16>
    %133 = vector.shape_cast %132 : vector<1x8x16xbf16> to vector<8x16xbf16>
    %cst_55 = arith.constant 0.000000e+00 : f32
    %134 = vector.broadcast %cst_55 : f32 to vector<8x288xf32>
    %135 = vector.extract_strided_slice %133 {offsets = [0, 0], sizes = [8, 4], strides = [1, 1]} : vector<8x16xbf16> to vector<8x4xbf16>
    %cst_56 = arith.constant dense<0.000000e+00> : vector<8x288xf32>
    %136 = tpu.matmul %135, %9, %cst_56 {dimension_numbers = #tpu.dot_dimension_numbers<[1], [0], [0], [1], [0, 0, 1, 1], [], []>} : vector<8x4xbf16>, vector<4x288xbf16>, vector<8x288xf32> -> vector<8x288xf32>
    %137 = arith.addf %134, %136 : vector<8x288xf32>
    %138 = vector.extract_strided_slice %133 {offsets = [0, 4], sizes = [8, 4], strides = [1, 1]} : vector<8x16xbf16> to vector<8x4xbf16>
    %cst_57 = arith.constant dense<0.000000e+00> : vector<8x288xf32>
    %139 = tpu.matmul %138, %10, %cst_57 {dimension_numbers = #tpu.dot_dimension_numbers<[1], [0], [0], [1], [0, 0, 1, 1], [], []>} : vector<8x4xbf16>, vector<4x288xbf16>, vector<8x288xf32> -> vector<8x288xf32>
    %140 = arith.addf %137, %139 : vector<8x288xf32>
    %141 = vector.extract_strided_slice %133 {offsets = [0, 8], sizes = [8, 4], strides = [1, 1]} : vector<8x16xbf16> to vector<8x4xbf16>
    %cst_58 = arith.constant dense<0.000000e+00> : vector<8x288xf32>
    %142 = tpu.matmul %141, %12, %cst_58 {dimension_numbers = #tpu.dot_dimension_numbers<[1], [0], [0], [1], [0, 0, 1, 1], [], []>} : vector<8x4xbf16>, vector<4x288xbf16>, vector<8x288xf32> -> vector<8x288xf32>
    %143 = arith.addf %140, %142 : vector<8x288xf32>
    %144 = vector.extract_strided_slice %133 {offsets = [0, 12], sizes = [8, 4], strides = [1, 1]} : vector<8x16xbf16> to vector<8x4xbf16>
    %cst_59 = arith.constant dense<0.000000e+00> : vector<8x288xf32>
    %145 = tpu.matmul %144, %13, %cst_59 {dimension_numbers = #tpu.dot_dimension_numbers<[1], [0], [0], [1], [0, 0, 1, 1], [], []>} : vector<8x4xbf16>, vector<4x288xbf16>, vector<8x288xf32> -> vector<8x288xf32>
    %146 = arith.addf %143, %145 : vector<8x288xf32>
    %147 = vector.broadcast %33 : vector<8x1xf32> to vector<8x288xf32>
    %148 = arith.addf %146, %147 : vector<8x288xf32>
    %149 = arith.truncf %148 : vector<8x288xf32> to vector<8x288xbf16>
    %c0_60 = arith.constant 0 : index
    %c3_61 = arith.constant 3 : index
    %c0_62 = arith.constant 0 : index
    %c0_63 = arith.constant 0 : index
    %150 = vector.load %arg5[%c0_60, %c3_61, %c0_62, %c0_63] : memref<1x4x8x288xbf16, #tpu.memory_space<vmem>>, vector<1x1x8x288xbf16>
    %151 = vector.shape_cast %150 : vector<1x1x8x288xbf16> to vector<8x288xbf16>
    %152 = vector.shape_cast %149 : vector<8x288xbf16> to vector<1x1x8x288xbf16>
    tpu.vector_store %arg5[%c0_60, %c3_61, %c0_62, %c0_63], %152 {strides = array<i32>} : memref<1x4x8x288xbf16, #tpu.memory_space<vmem>>, vector<1x1x8x288xbf16>,
    %cst_64 = arith.constant 0.000000e+00 : f32
    %153 = vector.shape_cast %32 : vector<1x288xi1> to vector<1x288xi1>
    %154 = vector.broadcast %153 : vector<1x288xi1> to vector<8x288xi1>
    %155 = vector.broadcast %cst_64 : f32 to vector<8x288xf32>
    %156 = arith.select %154, %146, %155 : vector<8x288xi1>, vector<8x288xf32>
    %cst_65 = arith.constant dense<0.000000e+00> : vector<8xf32>
    %157 = vector.multi_reduction <add>, %156, %cst_65 [1] : vector<8x288xf32> to vector<8xf32>
    %158 = vector.shape_cast %157 : vector<8xf32> to vector<8x1xf32>
    %159 = arith.addf %127, %158 : vector<8x1xf32>
    %160 = arith.mulf %156, %156 : vector<8x288xf32>
    %cst_66 = arith.constant dense<0.000000e+00> : vector<8xf32>
    %161 = vector.multi_reduction <add>, %160, %cst_66 [1] : vector<8x288xf32> to vector<8xf32>
    %162 = vector.shape_cast %161 : vector<8xf32> to vector<8x1xf32>
    %163 = arith.addf %131, %162 : vector<8x1xf32>
    %c0_67 = arith.constant 0 : index
    %c0_68 = arith.constant 0 : index
    %164 = vector.load %arg6[%c0_67, %c0_68] : memref<8x2xf32, #tpu.memory_space<vmem>>, vector<8x2xf32>
    %165 = tpu.concatenate %159, %163 in 1 : vector<8x1xf32>, vector<8x1xf32> -> vector<8x2xf32>
    %166 = arith.addf %164, %165 : vector<8x2xf32>
    %c0_69 = arith.constant 0 : index
    %c0_70 = arith.constant 0 : index
    %167 = vector.load %arg6[%c0_69, %c0_70] : memref<8x2xf32, #tpu.memory_space<vmem>>, vector<8x2xf32>
    tpu.vector_store %arg6[%c0_69, %c0_70], %166 {strides = array<i32>} : memref<8x2xf32, #tpu.memory_space<vmem>>, vector<8x2xf32>,
    return
  }
  func.func @transform_0(%arg0: i32, %arg1: i32) -> (i32, i32, i32) {
    %c0_i32 = arith.constant 0 : i32
    %c0_i32_0 = arith.constant 0 : i32
    %c0_i32_1 = arith.constant 0 : i32
    return %arg1, %c0_i32, %c0_i32_0 : i32, i32, i32
  }
  func.func @transform_1(%arg0: i32, %arg1: i32) -> (i32, i32, i32) {
    %c0_i32 = arith.constant 0 : i32
    %c0_i32_0 = arith.constant 0 : i32
    %c0_i32_1 = arith.constant 0 : i32
    return %c0_i32, %arg0, %c0_i32_0 : i32, i32, i32
  }
  func.func @transform_2(%arg0: i32, %arg1: i32) -> (i32, i32) {
    %c0_i32 = arith.constant 0 : i32
    %c0_i32_0 = arith.constant 0 : i32
    return %arg0, %c0_i32 : i32, i32
  }
  func.func @transform_3(%arg0: i32, %arg1: i32) -> (i32, i32, i32, i32) {
    %c0_i32 = arith.constant 0 : i32
    %c0_i32_0 = arith.constant 0 : i32
    %c0_i32_1 = arith.constant 0 : i32
    return %arg1, %c0_i32, %arg0, %c0_i32_0 : i32, i32, i32, i32
  }
  func.func @transform_4(%arg0: i32, %arg1: i32) -> (i32, i32) {
    %c0_i32 = arith.constant 0 : i32
    %c0_i32_0 = arith.constant 0 : i32
    return %arg0, %c0_i32 : i32, i32
  }
}

</mosaic_0001>

<bundles_post_ra>
// kernel: deconv_block.1
= control target key start
LH: loop header
LB: loop body
LE: loop exit
PB: predicated region body
PF: predicated region fallthrough
CT: control target
= control target key end

     0   :  { %s1939_s15 = smov 0   ;;  %s1941_s16 = smov 0   ;;  %s2402_s0 = inlined_call_operand.vmem [shape: bf16[2,4,326], index: 0, kind: input, shape index: {}]   ;;  %s2403_s1 = inlined_call_operand.vmem [shape: bf16[4,8,16], index: 1, kind: input, shape index: {}]   ;;  %s2404_s2 = inlined_call_operand.vmem [shape: f32[8,1], index: 2, kind: input, shape index: {}]   ;;  %s2405_s3 = inlined_call_operand.vmem [shape: bf16[2,4,8,288], index: 3, kind: output, shape index: {0}]   ;;  %s2406_s4 = inlined_call_operand.vmem [shape: f32[8,2], index: 4, kind: output, shape index: {1}]  }
   0x1   :  { %s1943_s17 = smov 0  }
   0x2 LB: > { %s24_s18 = sadd.s32 1, %s1895_s16  ;;  %p1773_p0 = scmp.ge.s32.totalorder %s1899_s17, 1  ;;  %s1899_s17 = sphi %s1943_s17, %s15_s17   ;;  %s1895_s16 = sphi %s1941_s16, %s2420_s16   ;;  %s1891_s15 = sphi %s1939_s15, %s2419_s15  }
   0x3   : > { %p25_p1 = scmp.ge.s32.totalorder %s24_s18, 2  ;;  %p197_p2 = scmp.lt.s32.totalorder %s1899_s17, 3 }
   0x5   : > { %s2422_s18 = smov (%p25_p1, %s24_s18), 0  ;;  %p198_p3 = pnand %p1773_p0, %p197_p2 }
   0x6   : > { %p239_p4 = scmp.lt.s32.totalorder (!%p198_p3), %s1891_s15, 1  ;;  %p1776_p5 = scmp.ne.s32.totalorder (!%p198_p3), %s1891_s15, 0 }
   0x7   : > { %201 = sbr.rel (%p198_p3) target bundleno = 591 (0x24f), region = 32 }
   0xc   : > { %s240_s19 = scalar_select %p239_p4, %s1891_s15, 1 }
   0xd   : > { %269 = sbr.rel (%p1776_p5) target bundleno = 20 (0x14), region = 36 }
   0xe   : > { %s1837_s20 = smul.u32 6, %s240_s19 }
   0xf   : > { %s1838_s21 = smul.u32 48, %s240_s19 }
  0x10   : > { %s243_s24 = scalar_lea.vmem %s2402_s0, %s1837_s20 }
  0x11   : > { %s1963_s27 = scalar_lea.vmem %s2405_s3, %s1838_s21 }
  0x12   : > { %vm270_vm0 = vcmask 15360   ;;  %v1901_v0 = vmov 0.0  }
  0x13   : > { %271 = vst.msk [vmem:[%s2406_s4] sm:$0xff] %vm270_vm0, %v1901_v0 }
  0x14 PF: > { %v1968_v1 = vld [vmem:[%s243_s24] sm:$0x3f]  ;;  %s1902_s6 = smov 127   ;;  %s1903_s7 = smov 124   ;;  %v2022_v35 = vld [vmem:[%s2403_s1 + $0x8] sm:$0xf] }
  0x15   : > { %390 = vst [vmem:[#allocation1] ss:$4 sm:$0xff] %v1968_v1  ;;  %v1974_v2 = vld [vmem:[%s2403_s1] sm:$0xf]  ;;  %s1904_s8 = smov 120   ;;  %s1905_s9 = smov 110   ;;  %v1005_v36 = vunpack.c.l.b16 %v2022_v35 }
  0x16   : > { %v385_v5 = vunpack.c.l.b16 %v1974_v2  ;;  %s1906_s10 = smov 116   ;;  %s1907_s11 = smov 109   ;;  %v2000_v17 = vld [vmem:[%s2403_s1 + $0x4] sm:$0xf]  ;;  %vm410_vm1 = vcmask 1041408   ;;  %vm406_vm2 = vcmask 31744  }
  0x17   : > { %s1908_s14 = smov 126   ;;  %v696_v21 = vunpack.c.l.b16 %v2000_v17  ;;  %s1909_s15 = smov 108   ;;  %v1006_v40 = vpack.c.b16 %v1005_v36, %v1005_v36  ;;  %vm526_vm3 = vcmask 900096   ;;  %v2051_v55 = vld [vmem:[%s2403_s1 + $0xc] sm:$0xf]  ;;  %vm403_vm4 = vcmask 1039360  }
  0x18   : > { %v386_v7 = vpack.c.b16 %v385_v5, %v385_v5  ;;  %s1910_s21 = smov 92   ;;  %s1911_s22 = smov 91   ;;  %v1314_v61 = vunpack.c.l.b16 %v2051_v55  ;;  %vm598_vm5 = vcmask 891904   ;;  %vm713_vm6 = vcmask 1031168  }
  0x19   : > { %v697_v22 = vpack.c.b16 %v696_v21, %v696_v21  ;;  %s1913_s25 = smov 90   ;;  %vm919_vm7 = vcmask 883712   ;;  %vm1156_vm8 = vcmask 752640   ;;  %vm1228_vm9 = vcmask 744448  }
  0x1a   : > { %vm1536_vm0 = vcmask 736256  }
  0x1c   : > { %v395_v3 = vld.sshfl [vmem:[#allocation1 + $0x10] sm:$0xff pattern:$0x73625140]  ;;  %v391_v4 = vld.sshfl [vmem:[#allocation1] sm:$0xff pattern:$0x73625140] }
  0x1d   : > { %401 = vrot.lane.b32.xlu0 %v395_v3, %s1902_s6  ;;  %397 = vrot.lane.b32.xlu1 %v391_v4, %s1902_s6  ;;  %v393_v6 = vld.sshfl [vmem:[#allocation1 + $0x8] sm:$0xff pattern:$0x73625140]  ;;  %v2060_v3 = vpack.c.b16 %v1314_v61, %v1314_v61 }
  0x1e   : > { %459 = vst [vmem:[#allocation1] ss:$4 sm:$0xff] %v1968_v1 }
  0x25   : > { %387 = vrot.lane.b32.xlu0 %v386_v7, %s1903_s7  ;;  %399 = vrot.lane.b32.xlu1 %v393_v6, %s1902_s6  ;;  %v1982_v8 = vld.sshfl [vmem:[#allocation1] sm:$0xff pattern:$0x73625140]  ;;  %v1984_v9 = vld.sshfl [vmem:[#allocation1 + $0x8] sm:$0xff pattern:$0x73625140] }
  0x26   : > { %v1986_v10 = vld.sshfl [vmem:[#allocation1 + $0x10] sm:$0xff pattern:$0x73625140]  ;;  %v466_v41 = vsel %vm410_vm1, %v1982_v8, 0  ;;  %v468_v6 = vsel %vm410_vm1, %v1984_v9, 0 }
  0x27   : > { %513 = vst [vmem:[#allocation1] ss:$4 sm:$0xff] %v1968_v1  ;;  %479 = vmatpush.bf16.msra.mxu3 %v466_v41 }
  0x2a   : > { %1780 = vmatmul.msk.bf16.vlgmr.msra.gmra.mxu3 %vm406_vm2, %v1974_v2 }
  0x2d   : > { %511 = vrot.lane.b32.xlu1 %v386_v7, %s1904_s8 }
  0x2e   : > { %v518_v11 = vld.sshfl [vmem:[#allocation1 + $0x10] sm:$0xff pattern:$0x73625140]  ;;  %v516_v12 = vld.sshfl [vmem:[#allocation1 + $0x8] sm:$0xff pattern:$0x73625140] }
  0x2f   : > { %524 = vrot.lane.b32.xlu0 %v518_v11, %s1905_s9  ;;  %v514_v13 = vld.sshfl [vmem:[#allocation1] sm:$0xff pattern:$0x73625140]  ;;  %v470_v11 = vsel %vm410_vm1, %v1986_v10, 0 }
  0x30   : > { %520 = vrot.lane.b32.xlu2 %v514_v13, %s1905_s9  ;;  %585 = vst [vmem:[#allocation1] ss:$4 sm:$0xff] %v1968_v1 }
  0x35   : > { %583 = vrot.lane.b32.xlu1 %v386_v7, %s1906_s10 }
  0x37   : > { %v590_v14 = vld.sshfl [vmem:[#allocation1 + $0x10] sm:$0xff pattern:$0x73625140]  ;;  %v586_v15 = vld.sshfl [vmem:[#allocation1] sm:$0xff pattern:$0x73625140] }
  0x38   : > { %596 = vrot.lane.b32.xlu0 %v590_v14, %s1907_s11  ;;  %v588_v16 = vld.sshfl [vmem:[#allocation1 + $0x8] sm:$0xff pattern:$0x73625140]  ;;  %522 = vrot.lane.b32.xlu2 %v516_v12, %s1905_s9 }
  0x39   : > { %700 = vst [vmem:[#allocation1] ss:$4 sm:$0xff] %v1968_v1 }
  0x40   : > { %v705_v18 = vld.sshfl [vmem:[#allocation1 + $0x10] sm:$0xff pattern:$0x73625140]  ;;  %v701_v19 = vld.sshfl [vmem:[#allocation1] sm:$0xff pattern:$0x73625140]  ;;  %594 = vrot.lane.b32.xlu2 %v588_v16, %s1907_s11 }
  0x41   : > { %711 = vrot.lane.b32.xlu0 %v705_v18, %s1908_s14  ;;  %v703_v20 = vld.sshfl [vmem:[#allocation1 + $0x8] sm:$0xff pattern:$0x73625140] }
  0x42   : > { %767 = vst [vmem:[#allocation1] ss:$4 sm:$0xff] %v1968_v1 }
  0x48   : > { %592 = vrot.lane.b32.xlu2 %v586_v15, %s1907_s11 }
  0x49   : > { %698 = vrot.lane.b32.xlu0 %v697_v22, %s1903_s7  ;;  %v768_v23 = vld.sshfl [vmem:[#allocation1] sm:$0xff pattern:$0x73625140]  ;;  %v770_v24 = vld.sshfl [vmem:[#allocation1 + $0x8] sm:$0xff pattern:$0x73625140] }
  0x4a   : > { %v772_v25 = vld.sshfl [vmem:[#allocation1 + $0x10] sm:$0xff pattern:$0x73625140]  ;;  %774 = vrot.lane.b32.xlu1 %v768_v23, %s1902_s6 }
  0x4b   : > { %835 = vst [vmem:[#allocation1] ss:$4 sm:$0xff] %v1968_v1 }
  0x50   : > { %776 = vrot.lane.b32.xlu2 %v770_v24, %s1902_s6 }
  0x52   : > { %v836_v26 = vld.sshfl [vmem:[#allocation1] sm:$0xff pattern:$0x73625140]  ;;  %v840_v27 = vld.sshfl [vmem:[#allocation1 + $0x10] sm:$0xff pattern:$0x73625140]  ;;  %707 = vrot.lane.b32.xlu1 %v701_v19, %s1908_s14 }
  0x53   : > { %842 = vrot.lane.b32.xlu0 %v836_v26, %s1907_s11  ;;  %v838_v28 = vld.sshfl [vmem:[#allocation1 + $0x8] sm:$0xff pattern:$0x73625140] }
  0x54   : > { %906 = vst [vmem:[#allocation1] ss:$4 sm:$0xff] %v1968_v1 }
  0x58   : > { %709 = vrot.lane.b32.xlu2 %v703_v20, %s1908_s14 }
  0x5a   : > { %844 = vrot.lane.b32.xlu1 %v838_v28, %s1907_s11 }
  0x5b   : > { %778 = vrot.lane.b32.xlu0 %v772_v25, %s1902_s6  ;;  %v911_v29 = vld.sshfl [vmem:[#allocation1 + $0x10] sm:$0xff pattern:$0x73625140]  ;;  %v907_v30 = vld.sshfl [vmem:[#allocation1] sm:$0xff pattern:$0x73625140] }
  0x5c   : > { %v909_v31 = vld.sshfl [vmem:[#allocation1 + $0x8] sm:$0xff pattern:$0x73625140] }
  0x5d   : > { %1009 = vst [vmem:[#allocation1] ss:$4 sm:$0xff] %v1968_v1 }
  0x60   : > { %846 = vrot.lane.b32.xlu2 %v840_v27, %s1907_s11  ;;  %v1912_v27 = vmov 0  }
  0x61   : > { %1876 = vset.pattern.permute.xlu0 %v1912_v27 }
  0x62   : > { %833 = vrot.lane.b32.xlu1 %v697_v22, %s1904_s8 }
  0x63   : > { %917 = vrot.lane.b32.xlu0 %v911_v29, %s1909_s15 }
  0x64   : > { %v1014_v32 = vld.sshfl [vmem:[#allocation1 + $0x10] sm:$0xff pattern:$0x73625140]  ;;  %v1010_v33 = vld.sshfl [vmem:[#allocation1] sm:$0xff pattern:$0x73625140] }
  0x65   : > { %v1012_v34 = vld.sshfl [vmem:[#allocation1 + $0x8] sm:$0xff pattern:$0x73625140] }
  0x66   : > { %1075 = vst [vmem:[#allocation1] ss:$4 sm:$0xff] %v1968_v1 }
  0x68   : > { %915 = vrot.lane.b32.xlu2 %v909_v31, %s1909_s15 }
  0x6a   : > { %904 = vrot.lane.b32.xlu1 %v697_v22, %s1906_s10 }
  0x6b   : > { %1020 = vrot.lane.b32.xlu0 %v1014_v32, %s1907_s11 }
  0x6d   : > { %v1076_v37 = vld.sshfl [vmem:[#allocation1] sm:$0xff pattern:$0x73625140]  ;;  %v1078_v38 = vld.sshfl [vmem:[#allocation1 + $0x8] sm:$0xff pattern:$0x73625140] }
  0x6e   : > { %v1080_v39 = vld.sshfl [vmem:[#allocation1 + $0x10] sm:$0xff pattern:$0x73625140] }
  0x6f   : > { %1143 = vst [vmem:[#allocation1] ss:$4 sm:$0xff] %v1968_v1 }
  0x70   : > { %913 = vrot.lane.b32.xlu2 %v907_v30, %s1909_s15 }
  0x72   : > { %1082 = vrot.lane.b32.xlu1 %v1076_v37, %s1905_s9 }
  0x73   : > { %1007 = vrot.lane.b32.xlu0 %v1006_v40, %s1903_s7 }
  0x76   : > { %v1148_v42 = vld.sshfl [vmem:[#allocation1 + $0x10] sm:$0xff pattern:$0x73625140]  ;;  %v1144_v43 = vld.sshfl [vmem:[#allocation1] sm:$0xff pattern:$0x73625140] }
  0x77   : > { %v1146_v44 = vld.sshfl [vmem:[#allocation1 + $0x8] sm:$0xff pattern:$0x73625140] }
  0x78   : > { %1215 = vst [vmem:[#allocation1] ss:$4 sm:$0xff] %v1968_v1  ;;  %1084 = vrot.lane.b32.xlu2 %v1078_v38, %s1905_s9 }
  0x7a   : > { %1016 = vrot.lane.b32.xlu1 %v1010_v33, %s1907_s11 }
  0x7b   : > { %1150 = vrot.lane.b32.xlu0 %v1144_v43, %s1910_s21 }
  0x7f   : > { %v1220_v45 = vld.sshfl [vmem:[#allocation1 + $0x10] sm:$0xff pattern:$0x73625140]  ;;  %v1216_v46 = vld.sshfl [vmem:[#allocation1] sm:$0xff pattern:$0x73625140] }
  0x80   : > { %v1218_v47 = vld.sshfl [vmem:[#allocation1 + $0x8] sm:$0xff pattern:$0x73625140]  ;;  %1018 = vrot.lane.b32.xlu2 %v1012_v34, %s1907_s11  ;;  %v382_v34 = vld [vmem:[%s2404_s2] sm:$0xff] }
  0x81   : > { %1318 = vst [vmem:[#allocation1] ss:$4 sm:$0xff] %v1968_v1 }
  0x82   : > { %1152 = vrot.lane.b32.xlu1 %v1146_v44, %s1910_s21 }
  0x83   : > { %1086 = vrot.lane.b32.xlu0 %v1080_v39, %s1905_s9 }
  0x88   : > { %v1323_v48 = vld.sshfl [vmem:[#allocation1 + $0x10] sm:$0xff pattern:$0x73625140]  ;;  %v1319_v49 = vld.sshfl [vmem:[#allocation1] sm:$0xff pattern:$0x73625140]  ;;  %1154 = vrot.lane.b32.xlu2 %v1148_v42, %s1910_s21 }
  0x89   : > { %v2042_v50 = vld.sshfl [vmem:[#allocation1 + $0x8] sm:$0xff pattern:$0x73625140] }
  0x8a   : > { %v521_v51 = vpop.permute.xlu2 %520  ;;  %1141 = vrot.lane.b32.xlu1 %v1006_v40, %s1904_s8  ;;  %1384 = vst [vmem:[#allocation1] ss:$4 sm:$0xff] %v1968_v1 }
  0x8b   : > { %1226 = vrot.lane.b32.xlu0 %v1220_v45, %s1911_s22 }
  0x8f   : > { %v402_v52 = vpop.permute.xlu0 %401  ;;  %v398_v53 = vpop.permute.xlu1 %397 }
  0x90   : > { %v418_v54 = vsel %vm410_vm1, %v402_v52, 0  ;;  %1224 = vrot.lane.b32.xlu2 %v1218_v47, %s1911_s22 }
  0x91   : > { %453 = vmatpush.bf16.msra.mxu2 %v418_v54  ;;  %v1385_v56 = vld.sshfl [vmem:[#allocation1] sm:$0xff pattern:$0x73625140]  ;;  %v1387_v57 = vld.sshfl [vmem:[#allocation1 + $0x8] sm:$0xff pattern:$0x73625140] }
  0x92   : > { %v523_v58 = vpop.permute.xlu2 %522  ;;  %1213 = vrot.lane.b32.xlu1 %v1006_v40, %s1906_s10  ;;  %v1389_v59 = vld.sshfl [vmem:[#allocation1 + $0x10] sm:$0xff pattern:$0x73625140] }
  0x93   : > { %1329 = vrot.lane.b32.xlu0 %v1323_v48, %s1909_s15  ;;  %v527_v60 = vsel %vm526_vm3, %v521_v51, %v523_v58  ;;  %1452 = vst [vmem:[#allocation1] ss:$4 sm:$0xff] %v1968_v1 }
  0x94   : > { %v533_v62 = vsel %vm410_vm1, %v527_v60, 0 }
  0x95   : > { %548 = vmatpush.bf16.msrb.mxu2 %v533_v62 }
  0x97   : > { %v388_v63 = vpop.permute.xlu0 %387  ;;  %v400_v0 = vpop.permute.xlu1 %399 }
  0x98   : > { %1779 = vmatmul.msk.bf16.vlgmr.msra.gmra.mxu2 %vm406_vm2, %v388_v63  ;;  %v404_v4 = vsel %vm403_vm4, %v398_v53, %v400_v0  ;;  %v405_v5 = vsel %vm403_vm4, %v400_v0, %v402_v52  ;;  %1222 = vrot.lane.b32.xlu2 %v1216_v46, %s1911_s22 }
  0x99   : > { %v412_v7 = vsel %vm410_vm1, %v404_v4, 0  ;;  %v415_v8 = vsel %vm410_vm1, %v405_v5, 0 }
  0x9a   : > { %427 = vmatpush.bf16.msra.mxu0 %v412_v7  ;;  %440 = vmatpush.bf16.msra.mxu1 %v415_v8  ;;  %v1457_v12 = vld.sshfl [vmem:[#allocation1 + $0x10] sm:$0xff pattern:$0x73625140]  ;;  %v595_v13 = vpop.permute.xlu2 %594  ;;  %v1453_v14 = vld.sshfl [vmem:[#allocation1] sm:$0xff pattern:$0x73625140] }
  0x9b   : > { %1316 = vrot.lane.b32.xlu0 %v2060_v3, %s1903_s7  ;;  %v1455_v15 = vld.sshfl [vmem:[#allocation1 + $0x8] sm:$0xff pattern:$0x73625140]  ;;  %1391 = vrot.lane.b32.xlu1 %v1385_v56, %s1907_s11 }
  0x9c   : > { %1523 = vst [vmem:[#allocation1] ss:$4 sm:$0xff] %v1968_v1 }
  0x9d   : > { %1777 = vmatmul.msk.bf16.vlgmr.msra.gmra.mxu0 %vm406_vm2, %v388_v63  ;;  %1778 = vmatmul.msk.bf16.vlgmr.msra.gmra.mxu1 %vm406_vm2, %v388_v63 }
  0x9e   : > { %492 = vmatpush.bf16.msrb.mxu0 %v468_v6  ;;  %505 = vmatpush.bf16.msrb.mxu1 %v470_v11 }
  0x9f   : > { %v512_v20 = vpop.permute.xlu1 %511 }
  0xa0   : > { %1393 = vrot.lane.b32.xlu2 %v1387_v57, %s1907_s11 }
  0xa1   : > { %v525_v9 = vpop.permute.xlu0 %524 }
  0xa2   : > { %v539_v10 = vsel %vm410_vm1, %v525_v9, 0  ;;  %v528_v16 = vsel %vm526_vm3, %v523_v58, %v525_v9  ;;  %v593_v18 = vpop.permute.xlu2 %592 }
  0xa3   : > { %574 = vmatpush.bf16.msra.mxu0 %v539_v10  ;;  %1459 = vrot.lane.b32.xlu0 %v1453_v14, %s1911_s22  ;;  %v536_v19 = vsel %vm410_vm1, %v528_v16, 0  ;;  %v599_v1 = vsel %vm598_vm5, %v593_v18, %v595_v13  ;;  %v1528_v28 = vld.sshfl [vmem:[#allocation1 + $0x10] sm:$0xff pattern:$0x73625140] }
  0xa4   : > { %561 = vmatpush.bf16.msrb.mxu3 %v536_v19  ;;  %1325 = vrot.lane.b32.xlu1 %v1319_v49, %s1909_s15  ;;  %v605_v21 = vsel %vm410_vm1, %v599_v1, 0  ;;  %v1526_v41 = vld.sshfl [vmem:[#allocation1 + $0x8] sm:$0xff pattern:$0x73625140] }
  0xa5   : > { %620 = vmatpush.bf16.msra.mxu1 %v605_v21  ;;  %v1524_v46 = vld.sshfl [vmem:[#allocation1] sm:$0xff pattern:$0x73625140] }
  0xa7   : > { %1784 = vmatmul.msk.bf16.vlgmr.msrb.gmra.mxu3 %vm406_vm2, %v512_v20  ;;  %v584_v29 = vpop.permute.xlu1 %583 }
  0xa8   : > { %1783 = vmatmul.msk.bf16.vlgmr.msrb.gmra.mxu2 %vm406_vm2, %v512_v20  ;;  %1327 = vrot.lane.b32.xlu2 %v2042_v50, %s1909_s15 }
  0xaa   : > { %v597_v22 = vpop.permute.xlu0 %596  ;;  %v2090_v23 = vpop.permute.xlu2 %776 }
  0xab   : > { %v600_v24 = vsel %vm598_vm5, %v595_v13, %v597_v22  ;;  %v611_v25 = vsel %vm410_vm1, %v597_v22, 0  ;;  %1395 = vrot.lane.b32.xlu0 %v1389_v59, %s1907_s11 }
  0xac   : > { %v608_v26 = vsel %vm410_vm1, %v600_v24, 0  ;;  %646 = vmatpush.bf16.msra.mxu3 %v611_v25  ;;  %1461 = vrot.lane.b32.xlu1 %v1455_v15, %s1911_s22 }
  0xad   : > { %1781 = vmatmul.msk.bf16.vlgmr.msrb.gmra.mxu0 %vm406_vm2, %v1974_v2  ;;  %1782 = vmatmul.msk.bf16.vlgmr.msrb.gmra.mxu1 %vm406_vm2, %v1974_v2 }
  0xae   : > { %633 = vmatpush.bf16.msra.mxu2 %v608_v26 }
  0xb0   : > { %1463 = vrot.lane.b32.xlu2 %v1457_v12, %s1911_s22 }
  0xb2   : > { %v710_v30 = vpop.permute.xlu2 %709 }
  0xb3   : > { %v712_v31 = vpop.permute.xlu0 %711  ;;  %1534 = vrot.lane.b32.xlu0 %v1528_v28, %s1913_s25 }
  0xb4   : > { %v726_v32 = vsel %vm410_vm1, %v712_v31, 0  ;;  %v715_v33 = vsel %vm713_vm6, %v710_v30, %v712_v31  ;;  %1450 = vrot.lane.b32.xlu1 %v2060_v3, %s1904_s8 }
  0xb5   : > { %v723_v2 = vsel %vm410_vm1, %v715_v33, 0  ;;  %761 = vmatpush.bf16.msrb.mxu2 %v726_v32  ;;  %v2170_v33 = vpop.f32.mrf.mxu3 }
  0xb6   : > { %748 = vmatpush.bf16.msrb.mxu1 %v723_v2 }
  0xb7   : > { %1788 = vmatmul.msk.bf16.vlgmr.msra.gmra.mxu3 %vm406_vm2, %v584_v29 }
  0xb8   : > { %1787 = vmatmul.msk.bf16.vlgmr.msra.gmra.mxu2 %vm406_vm2, %v584_v29  ;;  %1532 = vrot.lane.b32.xlu2 %v1526_v41, %s1913_s25 }
  0xba   : > { %v847_v36 = vpop.permute.xlu2 %846 }
  0xbb   : > { %v699_v37 = vpop.permute.xlu0 %698  ;;  %657 = vperm.xlu0 %1876, %v382_v34   ;;  %v860_v52 = vsel %vm410_vm1, %v847_v36, 0 }
  0xbc   : > { %v775_v38 = vpop.permute.xlu1 %774  ;;  %1521 = vrot.lane.b32.xlu1 %v2060_v3, %s1906_s10 }
  0xbd   : > { %v780_v39 = vsel %vm403_vm4, %v775_v38, %v2090_v23  ;;  %1785 = vmatmul.msk.bf16.vlgmr.msra.gmra.mxu0 %vm406_vm2, %v512_v20  ;;  %1786 = vmatmul.msk.bf16.vlgmr.msra.gmra.mxu1 %vm406_vm2, %v584_v29 }
  0xbe   : > { %v786_v40 = vsel %vm410_vm1, %v780_v39, 0 }
  0xbf   : > { %801 = vmatpush.bf16.msrb.mxu3 %v786_v40 }
  0xc0   : > { %1530 = vrot.lane.b32.xlu2 %v1524_v46, %s1913_s25 }
  0xc2   : > { %v916_v42 = vpop.permute.xlu2 %915 }
  0xc4   : > { %v708_v43 = vpop.permute.xlu1 %707 }
  0xc5   : > { %v843_v44 = vpop.permute.xlu0 %842  ;;  %v714_v45 = vsel %vm713_vm6, %v708_v43, %v710_v30 }
  0xc6   : > { %v720_v47 = vsel %vm410_vm1, %v714_v45, 0 }
  0xc7   : > { %1793 = vmatmul.msk.bf16.vlgmr.msrb.gmra.mxu3 %vm406_vm2, %v2000_v17  ;;  %735 = vmatpush.bf16.msrb.mxu0 %v720_v47 }
  0xc8   : > { %1792 = vmatmul.msk.bf16.vlgmr.msrb.gmra.mxu2 %vm406_vm2, %v699_v37 }
  0xca   : > { %v914_v48 = vpop.permute.xlu2 %913 }
  0xcb   : > { %v920_v49 = vsel %vm919_vm7, %v914_v48, %v916_v42 }
  0xcc   : > { %v845_v50 = vpop.permute.xlu1 %844  ;;  %v926_v56 = vsel %vm410_vm1, %v920_v49, 0 }
  0xcd   : > { %v779_v51 = vpop.permute.xlu0 %778  ;;  %v848_v53 = vsel %vm598_vm5, %v843_v44, %v845_v50  ;;  %v849_v54 = vsel %vm598_vm5, %v845_v50, %v847_v36  ;;  %1790 = vmatmul.msk.bf16.vlgmr.msrb.gmra.mxu0 %vm406_vm2, %v699_v37  ;;  %1791 = vmatmul.msk.bf16.vlgmr.msrb.gmra.mxu1 %vm406_vm2, %v699_v37  ;;  %v273_v44 = vlaneseq }
  0xce   : > { %v781_v57 = vsel %vm403_vm4, %v2090_v23, %v779_v51  ;;  %v792_v58 = vsel %vm410_vm1, %v779_v51, 0  ;;  %v854_v59 = vsel %vm410_vm1, %v848_v53, 0  ;;  %v857_v60 = vsel %vm410_vm1, %v849_v54, 0 }
  0xcf   : > { %v789_v61 = vsel %vm410_vm1, %v781_v57, 0  ;;  %869 = vmatpush.bf16.msra.mxu2 %v854_v59  ;;  %882 = vmatpush.bf16.msra.mxu3 %v857_v60  ;;  %v2186_v48 = vand.u32 127, %v273_v44 }
  0xd0   : > { %814 = vmatpush.bf16.msra.mxu0 %v789_v61  ;;  %827 = vmatpush.bf16.msra.mxu1 %v792_v58 }
  0xd1   : > { %v2194_v50 = vadd.s32 128, %v2186_v48  ;;  %v280_v51 = vand.u32 65535, %v2186_v48  ;;  %v2199_v53 = vadd.s32 256, %v2186_v48 }
  0xd2   : > { %v1085_v62 = vpop.permute.xlu2 %1084 }
  0xd3   : > { %v2203_v57 = vmul.u32 58254, %v280_v51  ;;  %v310_v58 = vshrl.u32 %v2194_v50, 16  ;;  %v283_v61 = vmul.u32 14564, %v280_v51 }
  0xd4   : > { %895 = vmatpush.bf16.msrb.mxu0 %v860_v52  ;;  %941 = vmatpush.bf16.msrb.mxu1 %v926_v56  ;;  %v834_v63 = vpop.permute.xlu1 %833  ;;  %v309_v52 = vand.u32 65535, %v2194_v50  ;;  %v281_v56 = vshrl.u32 %v2186_v48, 16 }
  0xd5   : > { %v918_v0 = vpop.permute.xlu0 %917 }
  0xd6   : > { %v932_v3 = vsel %vm410_vm1, %v918_v0, 0  ;;  %v921_v4 = vsel %vm919_vm7, %v916_v42, %v918_v0  ;;  %v483_v42 = vpop.f32.mrf.mxu3  ;;  %v2206_v59 = vmul.u32 58254, %v309_v52 }
  0xd7   : > { %v929_v5 = vsel %vm410_vm1, %v921_v4, 0  ;;  %1797 = vmatmul.msk.bf16.vlgmr.msra.gmra.mxu3 %vm406_vm2, %v834_v63  ;;  %v2217_v4 = vmul.u32 14564, %v310_v58 }
  0xd8   : > { %1796 = vmatmul.msk.bf16.vlgmr.msra.gmra.mxu2 %vm406_vm2, %v834_v63  ;;  %967 = vmatpush.bf16.msrb.mxu3 %v932_v3  ;;  %v312_v3 = vmul.u32 14564, %v309_v52  ;;  %v317_v42 = vshrl.u32 %v2206_v59, 16 }
  0xd9   : > { %954 = vmatpush.bf16.msrb.mxu2 %v929_v5  ;;  %v316_v5 = vshll.u32 %v2206_v59, 16 }
  0xda   : > { %v1019_v6 = vpop.permute.xlu2 %1018 }
  0xdb   : > { %vm320_vm11 = vc.u32 %v312_v3, %v316_v5 }
  0xdc   : > { %v905_v7 = vpop.permute.xlu1 %904 }
  0xdd   : > { %v1021_v8 = vpop.permute.xlu0 %1020  ;;  %1794 = vmatmul.msk.bf16.vlgmr.msra.gmra.mxu0 %vm406_vm2, %v2000_v17  ;;  %1795 = vmatmul.msk.bf16.vlgmr.msra.gmra.mxu1 %vm406_vm2, %v2000_v17 }
  0xde   : > { %v1034_v11 = vsel %vm410_vm1, %v1021_v8, 0  ;;  %v1023_v12 = vsel %vm598_vm5, %v1019_v6, %v1021_v8 }
  0xdf   : > { %v1031_v13 = vsel %vm410_vm1, %v1023_v12, 0  ;;  %1069 = vmatpush.bf16.msra.mxu2 %v1034_v11  ;;  %v339_v12 = vshrl.u32 %v2199_v53, 16 }
  0xe0   : > { %1056 = vmatpush.bf16.msra.mxu1 %v1031_v13 }
  0xe2   : > { %v1155_v14 = vpop.permute.xlu2 %1154 }
  0xe3   : > { %v1169_v2 = vsel %vm410_vm1, %v1155_v14, 0 }
  0xe4   : > { %v1083_v15 = vpop.permute.xlu1 %1082 }
  0xe5   : > { %v1008_v9 = vpop.permute.xlu0 %1007  ;;  %v1088_v10 = vsel %vm526_vm3, %v1083_v15, %v1085_v62  ;;  %v318_v15 = vshll.u32 %v2217_v4, 16 }
  0xe6   : > { %v1094_v16 = vsel %vm410_vm1, %v1088_v10, 0 }
  0xe7   : > { %1801 = vmatmul.msk.bf16.vlgmr.msrb.gmra.mxu3 %vm406_vm2, %v905_v7 }
  0xe8   : > { %1800 = vmatmul.msk.bf16.vlgmr.msrb.gmra.mxu2 %vm406_vm2, %v905_v7  ;;  %1109 = vmatpush.bf16.msra.mxu3 %v1094_v16  ;;  %v315_v16 = vmul.u32 58254, %v310_v58 }
  0xea   : > { %v1225_v17 = vpop.permute.xlu2 %1224 }
  0xec   : > { %v1017_v18 = vpop.permute.xlu1 %1016 }
  0xed   : > { %v1151_v19 = vpop.permute.xlu0 %1150  ;;  %1798 = vmatmul.msk.bf16.vlgmr.msrb.gmra.mxu0 %vm406_vm2, %v834_v63  ;;  %1799 = vmatmul.msk.bf16.vlgmr.msrb.gmra.mxu1 %vm406_vm2, %v905_v7  ;;  %v1022_v1 = vsel %vm598_vm5, %v1017_v18, %v1019_v6  ;;  %v287_v63 = vshll.u32 %v2203_v57, 16  ;;  %v338_v6 = vand.u32 65535, %v2199_v53  ;;  %v321_v18 = vsel %vm320_vm11, 1, %v1912_v27 }
  0xee   : > { %v1028_v20 = vsel %vm410_vm1, %v1022_v1, 0  ;;  %v343_v1 = vmul.u32 14564, %v339_v12 }
  0xef   : > { %1043 = vmatpush.bf16.msra.mxu0 %v1028_v20  ;;  %vm291_vm10 = vc.u32 %v283_v61, %v287_v63  ;;  %v293_v11 = vadd.s32 %v287_v63, %v283_v61 }
  0xf0   : > { %v292_v10 = vsel %vm291_vm10, 1, %v1912_v27  ;;  %v348_v63 = vshrl.u32 %v343_v1, 16 }
  0xf2   : > { %v1223_v21 = vpop.permute.xlu2 %1222 }
  0xf3   : > { %v1229_v32 = vsel %vm1228_vm9, %v1223_v21, %v1225_v17 }
  0xf4   : > { %v1153_v22 = vpop.permute.xlu1 %1152  ;;  %v1235_v34 = vsel %vm410_vm1, %v1229_v32, 0 }
  0xf5   : > { %v1087_v23 = vpop.permute.xlu0 %1086  ;;  %v1157_v24 = vsel %vm1156_vm8, %v1151_v19, %v1153_v22  ;;  %v1158_v25 = vsel %vm1156_vm8, %v1153_v22, %v1155_v14  ;;  %v286_v14 = vmul.u32 58254, %v281_v56  ;;  %v341_v19 = vmul.u32 14564, %v338_v6 }
  0xf6   : > { %v1089_v26 = vsel %vm526_vm3, %v1085_v62, %v1087_v23  ;;  %v1100_v28 = vsel %vm410_vm1, %v1087_v23, 0  ;;  %v1163_v29 = vsel %vm410_vm1, %v1157_v24, 0  ;;  %v1166_v30 = vsel %vm410_vm1, %v1158_v25, 0 }
  0xf7   : > { %v1097_v31 = vsel %vm410_vm1, %v1089_v26, 0  ;;  %1808 = vmatmul.msk.bf16.vlgmr.msra.gmra.mxu3 %vm406_vm2, %v2022_v35  ;;  %1178 = vmatpush.bf16.msrb.mxu2 %v1163_v29  ;;  %v2214_v62 = vmul.u32 14564, %v281_v56  ;;  %v294_v21 = vadd.s32 %v292_v10, %v286_v14  ;;  %v344_v22 = vmul.u32 58254, %v339_v12 }
  0xf8   : > { %1122 = vmatpush.bf16.msrb.mxu0 %v1097_v31  ;;  %1807 = vmatmul.msk.bf16.vlgmr.msra.gmra.mxu2 %vm406_vm2, %v1008_v9  ;;  %v323_v26 = vadd.s32 %v321_v18, %v315_v16  ;;  %v319_v56 = vshrl.u32 %v2217_v4, 16 }
  0xf9   : > { %1191 = vmatpush.bf16.msrb.mxu3 %v1166_v30  ;;  %1135 = vmatpush.bf16.msrb.mxu1 %v1100_v28  ;;  %v289_v8 = vshll.u32 %v2214_v62, 16  ;;  %v347_v30 = vshll.u32 %v343_v1, 16  ;;  %v290_v52 = vshrl.u32 %v2214_v62, 16 }
  0xfa   : > { %v2174_v36 = vpop.permute.xlu2 %1393 }
  0xfb   : > { %vm295_vm12 = vc.u32 %v293_v11, %v289_v8 }
  0xfc   : > { %v2176_v37 = vpop.permute.xlu1 %1141  ;;  %v296_v25 = vsel %vm295_vm12, 1, %v1912_v27 }
  0xfd   : > { %v1227_v38 = vpop.permute.xlu0 %1226  ;;  %1805 = vmatmul.msk.bf16.vlgmr.msra.gmra.mxu0 %vm406_vm2, %v1008_v9  ;;  %1806 = vmatmul.msk.bf16.vlgmr.msra.gmra.mxu1 %vm406_vm2, %v1008_v9  ;;  %v322_v9 = vadd.s32 %v316_v5, %v312_v3 }
  0xfe   : > { %v1241_v39 = vsel %vm410_vm1, %v1227_v38, 0  ;;  %1204 = vmatpush.bf16.msra.mxu0 %v1169_v2  ;;  %v1230_v40 = vsel %vm1228_vm9, %v1225_v17, %v1227_v38  ;;  %1250 = vmatpush.bf16.msra.mxu1 %v1235_v34  ;;  %v342_v17 = vmul.u32 58254, %v338_v6  ;;  %v288_v2 = vshrl.u32 %v2203_v57, 16 }
  0xff   : > { %v1238_v41 = vsel %vm410_vm1, %v1230_v40, 0  ;;  %1276 = vmatpush.bf16.msra.mxu3 %v1241_v39  ;;  %vm324_vm13 = vc.u32 %v322_v9, %v318_v15  ;;  %v298_v34 = vadd.s32 %v296_v25, %v294_v21 }
 0x100   : > { %1263 = vmatpush.bf16.msra.mxu2 %v1238_v41  ;;  %v345_v23 = vshll.u32 %v342_v17, 16  ;;  %v325_v29 = vsel %vm324_vm13, 1, %v1912_v27 }
 0x101   : > { %v327_v44 = vadd.s32 %v325_v29, %v323_v26 }
 0x102   : > { %v1328_v46 = vpop.permute.xlu2 %1327  ;;  %vm349_vm14 = vc.u32 %v341_v19, %v345_v23  ;;  %v351_v38 = vadd.s32 %v345_v23, %v341_v19 }
 0x103   : > { %v350_v32 = vsel %vm349_vm14, 1, %v1912_v27  ;;  %vm678_vm14 = vcmask 261120  }
 0x104   : > { %v2183_v43 = vpop.permute.xlu1 %1213  ;;  %v352_v39 = vadd.s32 %v350_v32, %v344_v22  ;;  %vm353_vm15 = vc.u32 %v351_v38, %v347_v30 }
 0x105   : > { %v1330_v45 = vpop.permute.xlu0 %1329 }
 0x106   : > { %v1343_v47 = vsel %vm410_vm1, %v1330_v45, 0  ;;  %v1332_v49 = vsel %vm919_vm7, %v1328_v46, %v1330_v45 }
 0x107   : > { %1812 = vmatmul.msk.bf16.vlgmr.msrb.gmra.mxu3 %vm406_vm2, %v2176_v37  ;;  %v1340_v54 = vsel %vm410_vm1, %v1332_v49, 0  ;;  %v354_v49 = vsel %vm353_vm15, 1, %v1912_v27  ;;  %v328_v27 = vadd.s32 %v327_v44, %v317_v42  ;;  %vm666_vm15 = vcmask 257024  }
 0x108   : > { %1811 = vmatmul.msk.bf16.vlgmr.msrb.gmra.mxu2 %vm406_vm2, %v2176_v37  ;;  %v356_v57 = vadd.s32 %v354_v49, %v352_v39 }
 0x109   : > { %1378 = vmatpush.bf16.msrb.mxu2 %v1343_v47  ;;  %v346_v47 = vshrl.u32 %v342_v17, 16 }
 0x10a   : > { %v2226_v13 = vpop.permute.xlu2 %1463 }
 0x10b   : > { %v357_v62 = vadd.s32 %v356_v57, %v346_v47 }
 0x10d   : > { %v2208_v60 = vpop.permute.xlu0 %1316  ;;  %1809 = vmatmul.msk.bf16.vlgmr.msrb.gmra.mxu0 %vm406_vm2, %v2022_v35  ;;  %1810 = vmatmul.msk.bf16.vlgmr.msrb.gmra.mxu1 %vm406_vm2, %v2022_v35  ;;  %v1392_v0 = vpop.permute.xlu1 %1391 }
 0x10e   : > { %1365 = vmatpush.bf16.msrb.mxu1 %v1340_v54  ;;  %v1397_v7 = vsel %vm598_vm5, %v1392_v0, %v2174_v36  ;;  %v299_v54 = vadd.s32 %v298_v34, %v288_v2 }
 0x10f   : > { %v1403_v35 = vsel %vm410_vm1, %v1397_v7, 0  ;;  %v329_v7 = vadd.s32 %v328_v27, %v319_v56 }
 0x110   : > { %1418 = vmatpush.bf16.msrb.mxu3 %v1403_v35  ;;  %v358_v35 = vadd.s32 %v357_v62, %v348_v63 }
 0x111   : > { %v330_v10 = vshrl.u32 %v329_v7, 4 }
 0x112   : > { %v359_v17 = vshrl.u32 %v358_v35, 4 }
 0x113   : > { %v331_v21 = vmul.u32 18, %v330_v10 }
 0x114   : > { %v360_v26 = vmul.u32 18, %v359_v17 }
 0x115   : > { %v1460_v20 = vpop.permute.xlu0 %1459  ;;  %v332_v29 = vsub.s32 %v2194_v50, %v331_v21 }
 0x116   : > { %v1326_v24 = vpop.permute.xlu1 %1325  ;;  %v361_v30 = vsub.s32 %v2199_v53, %v360_v26 }
 0x117   : > { %1816 = vmatmul.msk.bf16.vlgmr.msra.gmra.mxu3 %vm406_vm2, %v2183_v43  ;;  %v1331_v28 = vsel %vm919_vm7, %v1326_v24, %v1328_v46  ;;  %v1533_v46 = vpop.permute.xlu2 %1532  ;;  %v1477_v24 = vsel %vm410_vm1, %v2226_v13, 0 }
 0x118   : > { %1815 = vmatmul.msk.bf16.vlgmr.msra.gmra.mxu2 %vm406_vm2, %v2183_v43  ;;  %v1337_v31 = vsel %vm410_vm1, %v1331_v28, 0  ;;  %vm366_vm6 = vcmp.ne.s32.totalorder %v361_v30, 0  ;;  %vm369_vm7 = vcmp.lt.s32.totalorder %v361_v30, 0  ;;  %v375_v38 = vadd.s32 18, %v361_v30 }
 0x119   : > { %1352 = vmatpush.bf16.msrb.mxu0 %v1337_v31  ;;  %vm2291_vm10 = vmand %vm369_vm7, %vm366_vm6 }
 0x11a   : > { %v2241_v40 = vpop.f32.mrf.mxu0  ;;  %v2243_v41 = vpop.f32.mrf.mxu1 }
 0x11b   : > { %v2246_v45 = vpop.f32.mrf.mxu2  ;;  %v482_v44 = vadd.f32 %v2170_v33, %v2241_v40 }
 0x11d   : > { %v1396_v51 = vpop.permute.xlu0 %1395  ;;  %1813 = vmatmul.msk.bf16.vlgmr.msra.gmra.mxu0 %vm406_vm2, %v2176_v37  ;;  %1814 = vmatmul.msk.bf16.vlgmr.msra.gmra.mxu1 %vm406_vm2, %v2183_v43 }
 0x11e   : > { %v1398_v58 = vsel %vm598_vm5, %v2174_v36, %v1396_v51  ;;  %v1409_v59 = vsel %vm410_vm1, %v1396_v51, 0  ;;  %v1462_v61 = vpop.permute.xlu1 %1461  ;;  %v300_v36 = vadd.s32 %v299_v54, %v290_v52  ;;  %vm368_vm5 = vcmp.lt.s32.totalorder %v332_v29, 0 }
 0x11f   : > { %v1406_v0 = vsel %vm410_vm1, %v1398_v58, 0  ;;  %v1465_v37 = vsel %vm1228_vm9, %v1460_v20, %v1462_v61  ;;  %v1466_v43 = vsel %vm1228_vm9, %v1462_v61, %v2226_v13  ;;  %1444 = vmatpush.bf16.msra.mxu1 %v1409_v59  ;;  %v1531_v14 = vpop.permute.xlu2 %1530  ;;  %v378_v51 = vsel %vm2291_vm10, %v375_v38, %v361_v30 }
 0x120   : > { %1431 = vmatpush.bf16.msra.mxu0 %v1406_v0  ;;  %v1471_v3 = vsel %vm410_vm1, %v1465_v37, 0  ;;  %v1474_v4 = vsel %vm410_vm1, %v1466_v43, 0  ;;  %v301_v12 = vshrl.u32 %v300_v36, 4  ;;  %v1537_v18 = vsel %vm1536_vm0, %v1531_v14, %v1533_v46 }
 0x121   : > { %1486 = vmatpush.bf16.msra.mxu2 %v1471_v3  ;;  %1499 = vmatpush.bf16.msra.mxu3 %v1474_v4  ;;  %v1543_v25 = vsel %vm410_vm1, %v1537_v18, 0  ;;  %vm2318_vm13 = vcmp.lt.s32.totalorder %v378_v51, 16 }
 0x122   : > { %v431_v5 = vpop.f32.mrf.mxu0  ;;  %v444_v6 = vpop.f32.mrf.mxu1  ;;  %v302_v19 = vmul.u32 18, %v301_v12 }
 0x123   : > { %v457_v8 = vpop.f32.mrf.mxu2 }
 0x124   : > { %v303_v28 = vsub.s32 %v2186_v48, %v302_v19 }
 0x125   : > { %v1535_v11 = vpop.permute.xlu0 %1534 }
 0x126   : > { %v1549_v15 = vsel %vm410_vm1, %v1535_v11, 0  ;;  %v1538_v9 = vsel %vm1536_vm0, %v1533_v46, %v1535_v11  ;;  %vm364_vm3 = vcmp.ne.s32.totalorder %v303_v28, 0  ;;  %vm367_vm4 = vcmp.lt.s32.totalorder %v303_v28, 0  ;;  %v2280_v34 = vpop.permute.xlu1 %1450 }
 0x127   : > { %1823 = vmatmul.msk.bf16.vlgmr.msrb.gmra.mxu3 %vm406_vm2, %v2051_v55  ;;  %v1546_v16 = vsel %vm410_vm1, %v1538_v9, 0  ;;  %vm365_vm1 = vcmp.ne.s32.totalorder %v332_v29, 0  ;;  %vm2282_vm8 = vmand %vm367_vm4, %vm364_vm3  ;;  %v373_v50 = vadd.s32 18, %v303_v28  ;;  %vm1623_vm0 = vcmask 15360  }
 0x128   : > { %1822 = vmatmul.msk.bf16.vlgmr.msrb.gmra.mxu2 %vm406_vm2, %v2208_v60  ;;  %1584 = vmatpush.bf16.msrb.mxu3 %v1549_v15  ;;  %vm2286_vm9 = vmand %vm368_vm5, %vm365_vm1 }
 0x129   : > { %1571 = vmatpush.bf16.msrb.mxu2 %v1546_v16  ;;  %v376_v46 = vsel %vm2282_vm8, %v373_v50, %v303_v28 }
 0x12a   : > { %v563_v1 = vpop.f32.mrf.mxu3  ;;  %v494_v20 = vpop.f32.mrf.mxu0  ;;  %vm2310_vm11 = vcmp.lt.s32.totalorder %v376_v46, 16 }
 0x12b   : > { %v507_v22 = vpop.f32.mrf.mxu1  ;;  %v550_v23 = vpop.f32.mrf.mxu2  ;;  %v495_v39 = vadd.f32 %v494_v20, %v2243_v41 }
 0x12c   : > { %v508_v41 = vadd.f32 %v507_v22, %v2246_v45  ;;  %v580_v52 = vadd.f32 %v550_v23, %v482_v44 }
 0x12d   : > { %1820 = vmatmul.msk.bf16.vlgmr.msrb.gmra.mxu0 %vm406_vm2, %v2208_v60  ;;  %1821 = vmatmul.msk.bf16.vlgmr.msrb.gmra.mxu1 %vm406_vm2, %v2208_v60  ;;  %v374_v60 = vadd.s32 18, %v332_v29  ;;  %v2306_v49 = vpop.permute.xlu0 %657  ;;  %v581_v33 = vadd.f32 %v563_v1, %v495_v39 }
 0x12e   : > { %1512 = vmatpush.bf16.msrb.mxu0 %v1477_v24  ;;  %1558 = vmatpush.bf16.msrb.mxu1 %v1543_v25  ;;  %v1522_v19 = vpop.permute.xlu1 %1521 }
 0x12f   : > { %v377_v47 = vsel %vm2286_vm9, %v374_v60, %v332_v29 }
 0x130   : > { %vm2314_vm12 = vcmp.lt.s32.totalorder %v377_v47, 16 }
 0x132   : > { %v565_v13 = vpop.f32.mrf.mxu3  ;;  %v496_v31 = vpop.f32.mrf.mxu0 }
 0x133   : > { %v509_v32 = vpop.f32.mrf.mxu1  ;;  %v552_v2 = vpop.f32.mrf.mxu2 }
 0x137   : > { %1827 = vmatmul.msk.bf16.vlgmr.msra.gmra.mxu3 %vm406_vm2, %v2280_v34 }
 0x138   : > { %1826 = vmatmul.msk.bf16.vlgmr.msra.gmra.mxu2 %vm406_vm2, %v2280_v34 }
 0x13a   : > { %v648_v54 = vpop.f32.mrf.mxu3  ;;  %v576_v56 = vpop.f32.mrf.mxu0 }
 0x13b   : > { %v582_v40 = vadd.f32 %v576_v56, %v508_v41  ;;  %v622_v58 = vpop.f32.mrf.mxu1  ;;  %v635_v45 = vpop.f32.mrf.mxu2 }
 0x13c   : > { %v652_v61 = vadd.f32 %v622_v58, %v580_v52  ;;  %v653_v27 = vadd.f32 %v635_v45, %v581_v33 }
 0x13d   : > { %v654_v0 = vadd.f32 %v648_v54, %v582_v40  ;;  %1824 = vmatmul.msk.bf16.vlgmr.msra.gmra.mxu0 %vm406_vm2, %v2051_v55  ;;  %1825 = vmatmul.msk.bf16.vlgmr.msra.gmra.mxu1 %vm406_vm2, %v2051_v55 }
 0x13e   : > { %v674_v37 = vsel %vm2310_vm11, %v652_v61, 0.0  ;;  %v675_v43 = vsel %vm2314_vm12, %v653_v27, 0.0  ;;  %v660_v62 = vadd.f32 %v2306_v49, %v652_v61  ;;  %v661_v3 = vadd.f32 %v2306_v49, %v653_v27 }
 0x13f   : > { %v684_v4 = vmul.f32 %v674_v37, %v674_v37  ;;  %v685_v36 = vmul.f32 %v675_v43, %v675_v43  ;;  %v676_v5 = vsel %vm2318_vm13, %v654_v0, 0.0  ;;  %v677_v6 = vadd.f32 %v675_v43, %v674_v37 }
 0x140   : > { %v663_v7 = vpack.c.bf16 %v661_v3, %v660_v62  ;;  %v679_v55 = vsel %vm678_vm14, %v676_v5, 0.0  ;;  %v686_v8 = vmul.f32 %v676_v5, %v676_v5  ;;  %v662_v35 = vadd.f32 %v2306_v49, %v654_v0 }
 0x141   : > { %v680_v11 = vadd.f32 %v679_v55, %v677_v6  ;;  %v687_v12 = vadd.f32 %v685_v36, %v684_v4 }
 0x142   : > { %665 = vst [vmem:[%s1963_s27] sm:$0xff] %v663_v7  ;;  %v650_v14 = vpop.f32.mrf.mxu3  ;;  %v578_v15 = vpop.f32.mrf.mxu0  ;;  %v688_v9 = vsel %vm678_vm14, %v686_v8, 0.0  ;;  %v664_v10 = vpack.c.bf16 %v662_v35, %v662_v35 }
 0x143   : > { %v624_v16 = vpop.f32.mrf.mxu1  ;;  %v637_v17 = vpop.f32.mrf.mxu2  ;;  %681 = vadd.xlane.f32.xlu1 %v680_v11  ;;  %v689_v18 = vadd.f32 %v688_v9, %v687_v12 }
 0x144   : > { %667 = vst.msk [vmem:[%s1963_s27 + $0x8] sm:$0xf] %vm666_vm15, %v664_v10 }
 0x145   : > { %690 = vadd.xlane.f32.xlu2 %v689_v18 }
 0x147   : > { %1831 = vmatmul.msk.bf16.vlgmr.msrb.gmra.mxu3 %vm406_vm2, %v1522_v19 }
 0x148   : > { %1830 = vmatmul.msk.bf16.vlgmr.msrb.gmra.mxu2 %vm406_vm2, %v1522_v19 }
 0x14a   : > { %v803_v1 = vpop.f32.mrf.mxu3  ;;  %v737_v20 = vpop.f32.mrf.mxu0 }
 0x14b   : > { %v750_v21 = vpop.f32.mrf.mxu1  ;;  %v763_v22 = vpop.f32.mrf.mxu2  ;;  %v804_v60 = vadd.f32 %v803_v1, %v737_v20 }
 0x14d   : > { %1828 = vmatmul.msk.bf16.vlgmr.msrb.gmra.mxu0 %vm406_vm2, %v2280_v34  ;;  %1829 = vmatmul.msk.bf16.vlgmr.msrb.gmra.mxu1 %vm406_vm2, %v1522_v19  ;;  %vm1620_vm2 = vcmask 7168  }
 0x152   : > { %v805_v23 = vpop.f32.mrf.mxu3  ;;  %v739_v24 = vpop.f32.mrf.mxu0 }
 0x153   : > { %v752_v25 = vpop.f32.mrf.mxu1  ;;  %v765_v26 = vpop.f32.mrf.mxu2 }
 0x15a   : > { %v884_v28 = vpop.f32.mrf.mxu3  ;;  %v816_v29 = vpop.f32.mrf.mxu0 }
 0x15b   : > { %v829_v30 = vpop.f32.mrf.mxu1  ;;  %v871_v13 = vpop.f32.mrf.mxu2  ;;  %v817_v50 = vadd.f32 %v816_v29, %v750_v21 }
 0x15c   : > { %v830_v53 = vadd.f32 %v829_v30, %v763_v22  ;;  %v901_v38 = vadd.f32 %v871_v13, %v804_v60 }
 0x15d   : > { %v902_v42 = vadd.f32 %v884_v28, %v817_v50 }
 0x162   : > { %v886_v31 = vpop.f32.mrf.mxu3  ;;  %v818_v32 = vpop.f32.mrf.mxu0 }
 0x163   : > { %v831_v2 = vpop.f32.mrf.mxu1  ;;  %v873_v48 = vpop.f32.mrf.mxu2 }
 0x16a   : > { %v969_v39 = vpop.f32.mrf.mxu3  ;;  %v897_v34 = vpop.f32.mrf.mxu0 }
 0x16b   : > { %v903_v44 = vadd.f32 %v897_v34, %v830_v53  ;;  %v943_v46 = vpop.f32.mrf.mxu1  ;;  %v956_v47 = vpop.f32.mrf.mxu2 }
 0x16c   : > { %v973_v41 = vadd.f32 %v943_v46, %v901_v38  ;;  %v974_v51 = vadd.f32 %v956_v47, %v902_v42 }
 0x16d   : > { %v975_v52 = vadd.f32 %v969_v39, %v903_v44 }
 0x16e   : > { %v976_v54 = vadd.f32 %v973_v41, %v2306_v49  ;;  %v984_v56 = vsel %vm2310_vm11, %v973_v41, 0.0  ;;  %v977_v33 = vadd.f32 %v974_v51, %v2306_v49  ;;  %v985_v40 = vsel %vm2314_vm12, %v974_v51, 0.0 }
 0x16f   : > { %v978_v58 = vadd.f32 %v975_v52, %v2306_v49  ;;  %v993_v45 = vmul.f32 %v984_v56, %v984_v56  ;;  %v994_v61 = vmul.f32 %v985_v40, %v985_v40  ;;  %v986_v27 = vsel %vm2318_vm13, %v975_v52, 0.0 }
 0x170   : > { %v979_v0 = vpack.c.bf16 %v977_v33, %v976_v54  ;;  %v987_v37 = vadd.f32 %v985_v40, %v984_v56  ;;  %v988_v43 = vsel %vm678_vm14, %v986_v27, 0.0  ;;  %v995_v62 = vmul.f32 %v986_v27, %v986_v27 }
 0x171   : > { %v980_v3 = vpack.c.bf16 %v978_v58, %v978_v58  ;;  %v996_v4 = vadd.f32 %v994_v61, %v993_v45 }
 0x172   : > { %1802 = vst [vmem:[%s1963_s27 + $0xc] sm:$0xff] %v979_v0  ;;  %v971_v36 = vpop.f32.mrf.mxu3  ;;  %v899_v5 = vpop.f32.mrf.mxu0  ;;  %v989_v6 = vadd.f32 %v988_v43, %v987_v37  ;;  %v997_v7 = vsel %vm678_vm14, %v995_v62, 0.0 }
 0x173   : > { %1803 = vst.msk [vmem:[%s1963_s27 + $0x14] sm:$0xf] %vm666_vm15, %v980_v3  ;;  %v945_v55 = vpop.f32.mrf.mxu1  ;;  %v958_v8 = vpop.f32.mrf.mxu2  ;;  %v998_v35 = vadd.f32 %v997_v7, %v996_v4 }
 0x174   : > { %990 = vadd.xlane.f32.xlu0 %v989_v6 }
 0x175   : > { %999 = vadd.xlane.f32.xlu2 %v998_v35 }
 0x17a   : > { %v1111_v11 = vpop.f32.mrf.mxu3  ;;  %v1045_v12 = vpop.f32.mrf.mxu0 }
 0x17b   : > { %v1058_v14 = vpop.f32.mrf.mxu1  ;;  %v1071_v15 = vpop.f32.mrf.mxu2  ;;  %v1112_v26 = vadd.f32 %v1111_v11, %v1045_v12 }
 0x182   : > { %v1113_v9 = vpop.f32.mrf.mxu3  ;;  %v1047_v10 = vpop.f32.mrf.mxu0 }
 0x183   : > { %v1060_v16 = vpop.f32.mrf.mxu1  ;;  %v1073_v17 = vpop.f32.mrf.mxu2 }
 0x18a   : > { %v1193_v18 = vpop.f32.mrf.mxu3  ;;  %v1124_v19 = vpop.f32.mrf.mxu0 }
 0x18b   : > { %v1137_v1 = vpop.f32.mrf.mxu1  ;;  %v1180_v20 = vpop.f32.mrf.mxu2  ;;  %v1125_v25 = vadd.f32 %v1124_v19, %v1058_v14 }
 0x18c   : > { %v1138_v28 = vadd.f32 %v1137_v1, %v1071_v15  ;;  %v1210_v29 = vadd.f32 %v1180_v20, %v1112_v26 }
 0x18d   : > { %v1211_v31 = vadd.f32 %v1193_v18, %v1125_v25 }
 0x192   : > { %v1195_v21 = vpop.f32.mrf.mxu3  ;;  %v1126_v22 = vpop.f32.mrf.mxu0 }
 0x193   : > { %v1139_v23 = vpop.f32.mrf.mxu1  ;;  %v1182_v24 = vpop.f32.mrf.mxu2 }
 0x19a   : > { %v1278_v30 = vpop.f32.mrf.mxu3  ;;  %v1206_v13 = vpop.f32.mrf.mxu0 }
 0x19b   : > { %v1212_v32 = vadd.f32 %v1206_v13, %v1138_v28  ;;  %v1252_v2 = vpop.f32.mrf.mxu1  ;;  %v1265_v48 = vpop.f32.mrf.mxu2 }
 0x19c   : > { %v1282_v50 = vadd.f32 %v1252_v2, %v1210_v29  ;;  %v1283_v60 = vadd.f32 %v1265_v48, %v1211_v31 }
 0x19d   : > { %v1284_v53 = vadd.f32 %v1278_v30, %v1212_v32 }
 0x19e   : > { %v1285_v38 = vadd.f32 %v1282_v50, %v2306_v49  ;;  %v1293_v39 = vsel %vm2310_vm11, %v1282_v50, 0.0  ;;  %v1286_v34 = vadd.f32 %v1283_v60, %v2306_v49  ;;  %v1294_v42 = vsel %vm2314_vm12, %v1283_v60, 0.0 }
 0x19f   : > { %v1287_v44 = vadd.f32 %v1284_v53, %v2306_v49  ;;  %v1302_v46 = vmul.f32 %v1293_v39, %v1293_v39  ;;  %v1303_v47 = vmul.f32 %v1294_v42, %v1294_v42  ;;  %v1295_v41 = vsel %vm2318_vm13, %v1284_v53, 0.0 }
 0x1a0   : > { %v1288_v51 = vpack.c.bf16 %v1286_v34, %v1285_v38  ;;  %v1296_v52 = vadd.f32 %v1294_v42, %v1293_v39  ;;  %v1297_v54 = vsel %vm678_vm14, %v1295_v41, 0.0  ;;  %v1304_v56 = vmul.f32 %v1295_v41, %v1295_v41 }
 0x1a1   : > { %v1289_v33 = vpack.c.bf16 %v1287_v44, %v1287_v44  ;;  %v1305_v40 = vadd.f32 %v1303_v47, %v1302_v46 }
 0x1a2   : > { %1817 = vst [vmem:[%s1963_s27 + $0x18] sm:$0xff] %v1288_v51  ;;  %v1280_v58 = vpop.f32.mrf.mxu3  ;;  %v1208_v45 = vpop.f32.mrf.mxu0  ;;  %v1298_v61 = vadd.f32 %v1297_v54, %v1296_v52  ;;  %v1306_v27 = vsel %vm678_vm14, %v1304_v56, 0.0 }
 0x1a3   : > { %1818 = vst.msk [vmem:[%s1963_s27 + $0x20] sm:$0xf] %vm666_vm15, %v1289_v33  ;;  %v1254_v0 = vpop.f32.mrf.mxu1  ;;  %v1267_v37 = vpop.f32.mrf.mxu2  ;;  %v1307_v43 = vadd.f32 %v1306_v27, %v1305_v40 }
 0x1a4   : > { %1299 = vadd.xlane.f32.xlu1 %v1298_v61 }
 0x1a5   : > { %1308 = vadd.xlane.f32.xlu2 %v1307_v43  ;;  %v1619_v43 = vld [vmem:[%s2406_s4] sm:$0xff] }
 0x1aa   : > { %v1354_v62 = vpop.f32.mrf.mxu0  ;;  %v1420_v3 = vpop.f32.mrf.mxu3 }
 0x1ab   : > { %v1367_v4 = vpop.f32.mrf.mxu1  ;;  %v1380_v36 = vpop.f32.mrf.mxu2  ;;  %v1421_v17 = vadd.f32 %v1420_v3, %v1354_v62 }
 0x1b2   : > { %v1356_v5 = vpop.f32.mrf.mxu0  ;;  %v1422_v6 = vpop.f32.mrf.mxu3 }
 0x1b3   : > { %v1369_v7 = vpop.f32.mrf.mxu1  ;;  %v1382_v55 = vpop.f32.mrf.mxu2 }
 0x1b6   : > { %v682_v51 = vpop.xlane.xlu1 %681 }
 0x1b8   : > { %v691_v63 = vpop.xlane.xlu2 %690 }
 0x1ba   : > { %v1433_v8 = vpop.f32.mrf.mxu0  ;;  %v1501_v35 = vpop.f32.mrf.mxu3 }
 0x1bb   : > { %v1446_v11 = vpop.f32.mrf.mxu1  ;;  %v1488_v12 = vpop.f32.mrf.mxu2  ;;  %v1434_v16 = vadd.f32 %v1433_v8, %v1367_v4 }
 0x1bc   : > { %v1447_v18 = vadd.f32 %v1446_v11, %v1380_v36  ;;  %v1518_v19 = vadd.f32 %v1488_v12, %v1421_v17 }
 0x1bd   : > { %v1519_v1 = vadd.f32 %v1501_v35, %v1434_v16 }
 0x1c2   : > { %v1435_v14 = vpop.f32.mrf.mxu0  ;;  %v1503_v15 = vpop.f32.mrf.mxu3 }
 0x1c3   : > { %v1448_v9 = vpop.f32.mrf.mxu1  ;;  %v1490_v10 = vpop.f32.mrf.mxu2 }
 0x1ca   : > { %v1514_v20 = vpop.f32.mrf.mxu0  ;;  %v1586_v21 = vpop.f32.mrf.mxu3 }
 0x1cb   : > { %v1520_v22 = vadd.f32 %v1514_v20, %v1447_v18  ;;  %v1560_v23 = vpop.f32.mrf.mxu1  ;;  %v1573_v24 = vpop.f32.mrf.mxu2 }
 0x1cc   : > { %v1590_v25 = vadd.f32 %v1560_v23, %v1518_v19  ;;  %v1591_v26 = vadd.f32 %v1573_v24, %v1519_v1 }
 0x1cd   : > { %v1592_v28 = vadd.f32 %v1586_v21, %v1520_v22 }
 0x1ce   : > { %v1593_v29 = vadd.f32 %v1590_v25, %v2306_v49  ;;  %v1601_v30 = vsel %vm2310_vm11, %v1590_v25, 0.0  ;;  %v1594_v13 = vadd.f32 %v1591_v26, %v2306_v49  ;;  %v1602_v31 = vsel %vm2314_vm12, %v1591_v26, 0.0 }
 0x1cf   : > { %v1610_v32 = vmul.f32 %v1601_v30, %v1601_v30  ;;  %v1611_v2 = vmul.f32 %v1602_v31, %v1602_v31  ;;  %v1595_v48 = vadd.f32 %v1592_v28, %v2306_v49  ;;  %v1603_v50 = vsel %vm2318_vm13, %v1592_v28, 0.0 }
 0x1d0   : > { %v1596_v60 = vpack.c.bf16 %v1594_v13, %v1593_v29  ;;  %v1612_v53 = vmul.f32 %v1603_v50, %v1603_v50  ;;  %v1604_v38 = vadd.f32 %v1602_v31, %v1601_v30  ;;  %v1605_v39 = vsel %vm678_vm14, %v1603_v50, 0.0 }
 0x1d1   : > { %v1597_v57 = vpack.c.bf16 %v1595_v48, %v1595_v48  ;;  %v1613_v34 = vadd.f32 %v1611_v2, %v1610_v32 }
 0x1d2   : > { %1832 = vst [vmem:[%s1963_s27 + $0x24] sm:$0xff] %v1596_v60  ;;  %v1516_v42 = vpop.f32.mrf.mxu0  ;;  %v1606_v44 = vadd.f32 %v1605_v39, %v1604_v38  ;;  %v1588_v59 = vpop.f32.mrf.mxu3  ;;  %v1614_v46 = vsel %vm678_vm14, %v1612_v53, 0.0 }
 0x1d3   : > { %1833 = vst.msk [vmem:[%s1963_s27 + $0x2c] sm:$0xf] %vm666_vm15, %v1597_v57  ;;  %v1562_v47 = vpop.f32.mrf.mxu1  ;;  %v1575_v49 = vpop.f32.mrf.mxu2  ;;  %v1615_v41 = vadd.f32 %v1614_v46, %v1613_v34 }
 0x1d4   : > { %1607 = vadd.xlane.f32.xlu1 %v1606_v44 }
 0x1d5   : > { %1616 = vadd.xlane.f32.xlu2 %v1615_v41 }
 0x1e7   : > { %v991_v33 = vpop.xlane.xlu0 %990 }
 0x1e8   : > { %v1000_v52 = vpop.xlane.xlu2 %999  ;;  %v992_v40 = vadd.f32 %v991_v33, %v682_v51 }
 0x1e9   : > { %v1001_v58 = vadd.f32 %v1000_v52, %v691_v63 }
 0x217   : > { %v1300_v54 = vpop.xlane.xlu1 %1299 }
 0x218   : > { %v1309_v56 = vpop.xlane.xlu2 %1308  ;;  %v1301_v45 = vadd.f32 %v1300_v54, %v992_v40 }
 0x219   : > { %v1310_v61 = vadd.f32 %v1309_v56, %v1001_v58 }
 0x247   : > { %v1608_v27 = vpop.xlane.xlu1 %1607 }
 0x248   : > { %v1617_v0 = vpop.xlane.xlu2 %1616  ;;  %v1609_v37 = vadd.f32 %v1608_v27, %v1301_v45 }
 0x249   : > { %v1618_v62 = vadd.f32 %v1617_v0, %v1310_v61 }
 0x24b   : > { %v1621_v3 = vsel %vm1620_vm2, %v1609_v37, %v1618_v62 }
 0x24c   : > { %v1622_v4 = vadd.f32 %v1621_v3, %v1619_v43 }
 0x24e   : > { %1624 = vst.msk [vmem:[%s2406_s4] sm:$0xff] %vm1623_vm0, %v1622_v4 }
 0x24f PF: > { %s15_s17 = sadd.s32 1, %s1899_s17   ;;  %s2419_s15 = smov %s1895_s16 }
 0x250   : > { %p12_p6 = scmp.ge.s32.totalorder %s15_s17, 4   ;;  %s2420_s16 = smov %s2422_s18 }
 0x252   :  { %14 = sbr.rel (!%p12_p6) target bundleno = 2 (0x2), region = 90 }

</bundles_post_ra>
